<compile_context>
chip_gen: v7x
topology: tpu7x:2x2x1
jax: 0.10.0
libtpu: 0.0.40
codegen_flags: <defaults>
</compile_context>

<pallas_src>
import functools

import jax
import jax.numpy as jnp
import numpy as np
from jax.experimental import pallas as pl
from jax.experimental.pallas import tpu as pltpu

EPS = 1e-5
LANE = 128


def _round_up(n, m=LANE):
    return ((n + m - 1) // m) * m


# ----------------------------------------------------------------------------
# Fused Pallas kernel: one grid step = one image of the whole basic block
# ----------------------------------------------------------------------------
def _basic_block_kernel(x_ref, w1_ref, s1_ref, b1_ref,
                        w2_ref, s2_ref, b2_ref, *rest,
                        stride, oh, ow, has_projection):
    if has_projection:
        ws_ref, ss_ref, bs_ref, o_ref, h1p_ref = rest
    else:
        o_ref, h1p_ref = rest

    s = stride
    m = oh * ow
    cp_in = x_ref.shape[-1]
    cp_out = w1_ref.shape[-1]
    hs = x_ref.shape[0] // (s * s)          # rows per stride-phase

    def x_tap(di, dj):
        # x_pad[s*r + di, s*c + dj, :]  for r in [0,oh), c in [0,ow).
        # The wrapper laid x out phase-decomposed so this is a CONTIGUOUS slice
        # (no strided loads, no im2col in HBM).
        p = (di % s) * s + (dj % s)
        r0 = p * hs + di // s
        c0 = dj // s
        return x_ref[r0:r0 + oh, c0:c0 + ow, :]

    # ---- conv1 (3x3, stride s) as 9 accumulated bf16 MXU matmuls -----------
    acc1 = jnp.zeros((m, cp_out), jnp.float32)
    for di in range(3):
        for dj in range(3):
            lhs = x_tap(di, dj).reshape(m, cp_in)
            acc1 = acc1 + jnp.dot(lhs, w1_ref[di * 3 + dj],
                                  preferred_element_type=jnp.float32)
    # folded BN + FiLM + ReLU (single f32 epilogue pass)
    h1 = jnp.maximum(acc1 * s1_ref[...] + b1_ref[...], 0.0)

    # Stage relu(conv1) into a zero-padded bf16 VMEM halo buffer for conv2's
    # taps (single cast here instead of 9 casts in the conv2 loop).
    h1p_ref[...] = jnp.zeros_like(h1p_ref)
    h1p_ref[1:1 + oh, 1:1 + ow, :] = (
        h1.astype(h1p_ref.dtype).reshape(oh, ow, cp_out))

    # ---- shortcut branch (fused; no extra HBM round-trip) -------------------
    # Original pixel (s*r, s*c) sits at padded index (s*r + 1, s*c + 1).
    sc_in = x_tap(1, 1).reshape(m, cp_in)
    if has_projection:
        sc = jnp.dot(sc_in, ws_ref[...], preferred_element_type=jnp.float32)
        sc = sc * ss_ref[...] + bs_ref[...]
    else:
        # identity shortcut (cp_in == cp_out in this case)
        sc = sc_in.astype(jnp.float32)

    # ---- conv2 (3x3, stride 1) + BN + FiLM + residual add + ReLU ------------
    acc2 = jnp.zeros((m, cp_out), jnp.float32)
    for di in range(3):
        for dj in range(3):
            lhs = h1p_ref[di:di + oh, dj:dj + ow, :].reshape(m, cp_out)
            acc2 = acc2 + jnp.dot(lhs, w2_ref[di * 3 + dj],
                                  preferred_element_type=jnp.float32)
    out = jnp.maximum(acc2 * s2_ref[...] + b2_ref[...] + sc, 0.0)
    o_ref[...] = out.reshape(oh, ow, cp_out).astype(o_ref.dtype)


# ----------------------------------------------------------------------------
# One-time parameter preparation (hoisted out of the forward pass)
# ----------------------------------------------------------------------------
def _fold_bn_film(bn, film, cp):
    g, b, mean, var = bn
    fg, fb = film
    inv = g / jnp.sqrt(var + EPS)
    scale = inv * fg
    bias = (b - mean * inv) * fg + fb
    c = scale.shape[0]
    scale = jnp.pad(scale, (0, cp - c)).reshape(1, cp).astype(jnp.float32)
    bias = jnp.pad(bias, (0, cp - c)).reshape(1, cp).astype(jnp.float32)
    return scale, bias


def _prep_conv_weight(w_oihw, cp_in, cp_out):
    # (Cout, Cin, KH, KW) -> (KH*KW, cp_in, cp_out) per-tap matrices, bf16.
    co, ci, kh, kw = w_oihw.shape
    wm = jnp.transpose(w_oihw, (2, 3, 1, 0)).reshape(kh * kw, ci, co)
    wm = jnp.pad(wm, ((0, 0), (0, cp_in - ci), (0, cp_out - co)))
    return wm.astype(jnp.bfloat16)


def prepare_block_params(params, in_channels, out_channels, stride):
    cp_in = _round_up(in_channels)
    cp_out = _round_up(out_channels)
    has_projection = (stride != 1) or (in_channels != out_channels)
    if not has_projection:
        assert cp_in == cp_out

    prep = {
        "w1": _prep_conv_weight(params["w1"], cp_in, cp_out),
        "w2": _prep_conv_weight(params["w2"], cp_out, cp_out),
    }
    prep["s1"], prep["b1"] = _fold_bn_film(params["bn1"], params["film1"], cp_out)
    prep["s2"], prep["b2"] = _fold_bn_film(params["bn2"], params["film2"], cp_out)
    if has_projection:
        prep["ws"] = _prep_conv_weight(params["ws"], cp_in, cp_out)[0]
        prep["ss"], prep["bs"] = _fold_bn_film(params["bns"], params["films"],
                                               cp_out)
    meta = dict(cin=in_channels, cout=out_channels, cp_in=cp_in, cp_out=cp_out,
                stride=stride, has_projection=has_projection)
    return prep, meta


# ----------------------------------------------------------------------------
# Forward (Pallas path); pre/post layout plumbing fused under one jit.
# ----------------------------------------------------------------------------
@functools.partial(
    jax.jit,
    static_argnames=("stride", "cin", "cout", "cp_in", "cp_out",
                     "has_projection"))
def _forward_impl(x_nchw, prep, *, stride, cin, cout, cp_in, cp_out,
                  has_projection):
    s = stride
    x = jnp.transpose(x_nchw, (0, 2, 3, 1))              # NCHW -> NHWC
    N, H, W, _ = x.shape
    OH = (H + 2 - 3) // s + 1
    OW = (W + 2 - 3) // s + 1

    # One cheap padding pass: spatial halo of 1, channels -> multiple of 128,
    # bf16 for MXU + halved DMA bytes.
    Hp, Wp = H + 2, W + 2
    Hs, Ws = -(-Hp // s), -(-Wp // s)
    xp = jnp.pad(x, ((0, 0),
                     (1, 1 + Hs * s - Hp),
                     (1, 1 + Ws * s - Wp),
                     (0, cp_in - cin))).astype(jnp.bfloat16)
    # Stride-phase decomposition (space-to-depth by the conv stride) so every
    # 3x3 tap inside the kernel is a contiguous window.
    x_ph = xp.reshape(N, Hs, s, Ws, s, cp_in)
    x_ph = x_ph.transpose(0, 2, 4, 1, 3, 5).reshape(N, s * s * Hs, Ws, cp_in)

    args = [x_ph, prep["w1"], prep["s1"], prep["b1"],
            prep["w2"], prep["s2"], prep["b2"]]
    in_specs = [
        pl.BlockSpec((None, s * s * Hs, Ws, cp_in), lambda n: (n, 0, 0, 0)),
        pl.BlockSpec((9, cp_in, cp_out), lambda n: (0, 0, 0)),
        pl.BlockSpec((1, cp_out), lambda n: (0, 0)),
        pl.BlockSpec((1, cp_out), lambda n: (0, 0)),
        pl.BlockSpec((9, cp_out, cp_out), lambda n: (0, 0, 0)),
        pl.BlockSpec((1, cp_out), lambda n: (0, 0)),
        pl.BlockSpec((1, cp_out), lambda n: (0, 0)),
    ]
    if has_projection:
        args += [prep["ws"], prep["ss"], prep["bs"]]
        in_specs += [
            pl.BlockSpec((cp_in, cp_out), lambda n: (0, 0)),
            pl.BlockSpec((1, cp_out), lambda n: (0, 0)),
            pl.BlockSpec((1, cp_out), lambda n: (0, 0)),
        ]

    kernel = functools.partial(_basic_block_kernel, stride=s, oh=OH, ow=OW,
                               has_projection=has_projection)
    out = pl.pallas_call(
        kernel,
        out_shape=jax.ShapeDtypeStruct((N, OH, OW, cp_out), jnp.float32),
        grid=(N,),
        in_specs=in_specs,
        out_specs=pl.BlockSpec((None, OH, OW, cp_out), lambda n: (n, 0, 0, 0)),
        scratch_shapes=[pltpu.VMEM((OH + 2, OW + 2, cp_out), jnp.bfloat16)],
        compiler_params=pltpu.CompilerParams(
            dimension_semantics=("parallel",)),
    )(*args)

    out = out[..., :cout]                                # drop channel padding
    return jnp.transpose(out, (0, 3, 1, 2))              # NHWC -> NCHW


def basic_block_film_forward(x_nchw, prep, meta):
    return _forward_impl(x_nchw, prep, **meta)


# ----------------------------------------------------------------------------
# Pure-JAX reference (for correctness check)
# ----------------------------------------------------------------------------
def basic_block_film_ref(x_nchw, params, stride):
    def conv(x, w, st, pad):
        return jax.lax.conv_general_dilated(
            x, w, (st, st), [(pad, pad), (pad, pad)],
            dimension_numbers=("NCHW", "OIHW", "NCHW"))

    def bn_film(x, bn, film):
        g, b, m, v = bn
        fg, fb = film
        inv = (g / jnp.sqrt(v + EPS))[None, :, None, None]
        y = (x - m[None, :, None, None]) * inv + b[None, :, None, None]
        return y * fg[None, :, None, None] + fb[None, :, None, None]

    Cin = x_nchw.shape[1]
    Cout = params["w1"].shape[0]
    r = conv(x_nchw, params["w1"], stride, 1)
    r = jnp.maximum(bn_film(r, params["bn1"], params["film1"]), 0.0)
    r = conv(r, params["w2"], 1, 1)
    r = bn_film(r, params["bn2"], params["film2"])
    if stride != 1 or Cin != Cout:
        s = conv(x_nchw, params["ws"], stride, 0)
        s = bn_film(s, params["bns"], params["films"])
    else:
        s = x_nchw
    return jnp.maximum(r + s, 0.0)


# ----------------------------------------------------------------------------
# Deterministic parameter init (shapes per the module's __init__)
# ----------------------------------------------------------------------------
def make_params(key, in_channels, out_channels):
    keys = jax.random.split(key, 12)

    def bn_params(k, c):
        k0, k1, k2, k3 = jax.random.split(k, 4)
        gamma = 1.0 + 0.1 * jax.random.normal(k0, (c,), jnp.float32)
        beta = 0.1 * jax.random.normal(k1, (c,), jnp.float32)
        mean = 0.1 * jax.random.normal(k2, (c,), jnp.float32)
        var = 1.0 + 0.1 * jnp.abs(jax.random.normal(k3, (c,), jnp.float32))
        return (gamma, beta, mean, var)

    def film_params(k, c):
        k0, k1 = jax.random.split(k, 2)
        gamma = 1.0 + 0.05 * jax.random.normal(k0, (c,), jnp.float32)
        beta = 0.05 * jax.random.normal(k1, (c,), jnp.float32)
        return (gamma, beta)

    c_in, c_out = in_channels, out_channels
    return {
        "w1": 0.1 * jax.random.normal(keys[0], (c_out, c_in, 3, 3), jnp.float32),
        "bn1": bn_params(keys[1], c_out),
        "film1": film_params(keys[2], c_out),
        "w2": 0.1 * jax.random.normal(keys[3], (c_out, c_out, 3, 3), jnp.float32),
        "bn2": bn_params(keys[4], c_out),
        "film2": film_params(keys[5], c_out),
        "ws": 0.1 * jax.random.normal(keys[6], (c_out, c_in, 1, 1), jnp.float32),
        "bns": bn_params(keys[7], c_out),
        "films": film_params(keys[8], c_out),
    }


if __name__ == "__main__":
    key = jax.random.PRNGKey(0)
    k_x1, k_p1, k_x2, k_p2 = jax.random.split(key, 4)

    # ---- Config A: projection shortcut (stride 2, channel change) ----------
    in_c, out_c, stride = 4, 8, 2
    x1 = jax.random.normal(k_x1, (2, in_c, 16, 16), jnp.float32)   # NCHW
    params1 = make_params(k_p1, in_c, out_c)
    prep1, meta1 = prepare_block_params(params1, in_c, out_c, stride)
    out_pallas1 = jax.block_until_ready(
        basic_block_film_forward(x1, prep1, meta1))
    out_ref1 = jax.block_until_ready(basic_block_film_ref(x1, params1, stride))
    assert out_pallas1.shape == (2, out_c, 8, 8)
    np.testing.assert_allclose(np.asarray(out_pallas1), np.asarray(out_ref1),
                               rtol=3e-2, atol=3e-2)

    # ---- Config B: identity shortcut (stride 1, same channels) -------------
    in_c2 = out_c2 = 8
    x2 = jax.random.normal(k_x2, (2, in_c2, 16, 16), jnp.float32)
    params2 = make_params(k_p2, in_c2, out_c2)
    prep2, meta2 = prepare_block_params(params2, in_c2, out_c2, 1)
    out_pallas2 = jax.block_until_ready(
        basic_block_film_forward(x2, prep2, meta2))
    out_ref2 = jax.block_until_ready(basic_block_film_ref(x2, params2, 1))
    assert out_pallas2.shape == (2, out_c2, 16, 16)
    np.testing.assert_allclose(np.asarray(out_pallas2), np.asarray(out_ref2),
                               rtol=3e-2, atol=3e-2)

    print("KERNEL_OK")
</pallas_src>

<mosaic_0001>
module attributes {stable_mosaic.version = 11 : i64} {
  func.func @_basic_block_kernel(%arg0: i32, %arg1: memref<1x36x9x128xbf16, #tpu.memory_space<vmem>>, %arg2: memref<9x128x128xbf16, #tpu.memory_space<vmem>>, %arg3: memref<1x128xf32, #tpu.memory_space<vmem>>, %arg4: memref<1x128xf32, #tpu.memory_space<vmem>>, %arg5: memref<9x128x128xbf16, #tpu.memory_space<vmem>>, %arg6: memref<1x128xf32, #tpu.memory_space<vmem>>, %arg7: memref<1x128xf32, #tpu.memory_space<vmem>>, %arg8: memref<128x128xbf16, #tpu.memory_space<vmem>>, %arg9: memref<1x128xf32, #tpu.memory_space<vmem>>, %arg10: memref<1x128xf32, #tpu.memory_space<vmem>>, %arg11: memref<1x8x8x128xf32, #tpu.memory_space<vmem>>, %arg12: memref<10x10x128xbf16, #tpu.memory_space<vmem>>) attributes {dimension_semantics = [#tpu.dimension_semantics<parallel>], iteration_bounds = array<i64: 2>, scalar_prefetch = 0 : i64, scratch_operands = 1 : i64, tpu.core_type = #tpu.core_type<tc>, window_params = [{transform_indices = @transform_0, window_bounds = array<i64: 1, 36, 9, 128>}, {pipeline_mode = #tpu.pipeline_mode<synchronous>, transform_indices = @transform_1, window_bounds = array<i64: 9, 128, 128>}, {pipeline_mode = #tpu.pipeline_mode<synchronous>, transform_indices = @transform_2, window_bounds = array<i64: 1, 128>}, {pipeline_mode = #tpu.pipeline_mode<synchronous>, transform_indices = @transform_3, window_bounds = array<i64: 1, 128>}, {pipeline_mode = #tpu.pipeline_mode<synchronous>, transform_indices = @transform_4, window_bounds = array<i64: 9, 128, 128>}, {pipeline_mode = #tpu.pipeline_mode<synchronous>, transform_indices = @transform_5, window_bounds = array<i64: 1, 128>}, {pipeline_mode = #tpu.pipeline_mode<synchronous>, transform_indices = @transform_6, window_bounds = array<i64: 1, 128>}, {pipeline_mode = #tpu.pipeline_mode<synchronous>, transform_indices = @transform_7, window_bounds = array<i64: 128, 128>}, {pipeline_mode = #tpu.pipeline_mode<synchronous>, transform_indices = @transform_8, window_bounds = array<i64: 1, 128>}, {pipeline_mode = #tpu.pipeline_mode<synchronous>, transform_indices = @transform_9, window_bounds = array<i64: 1, 128>}, {transform_indices = @transform_10, window_bounds = array<i64: 1, 8, 8, 128>}]} {
    %cst = arith.constant 0.000000e+00 : f32
    %0 = vector.broadcast %cst : f32 to vector<64x128xf32>
    %c0 = arith.constant 0 : index
    %c0_0 = arith.constant 0 : index
    %c0_1 = arith.constant 0 : index
    %c0_2 = arith.constant 0 : index
    %1 = vector.load %arg1[%c0, %c0_0, %c0_1, %c0_2] : memref<1x36x9x128xbf16, #tpu.memory_space<vmem>>, vector<1x8x8x128xbf16>
    %2 = vector.shape_cast %1 : vector<1x8x8x128xbf16> to vector<8x8x128xbf16>
    %3 = vector.shape_cast %2 : vector<8x8x128xbf16> to vector<64x128xbf16>
    %c0_3 = arith.constant 0 : index
    %c0_4 = arith.constant 0 : index
    %c0_5 = arith.constant 0 : index
    %4 = vector.load %arg2[%c0_3, %c0_4, %c0_5] : memref<9x128x128xbf16, #tpu.memory_space<vmem>>, vector<1x128x128xbf16>
    %5 = vector.shape_cast %4 : vector<1x128x128xbf16> to vector<128x128xbf16>
    %cst_6 = arith.constant dense<0.000000e+00> : vector<64x128xf32>
    %6 = tpu.matmul %3, %5, %cst_6 {dimension_numbers = #tpu.dot_dimension_numbers<[1], [0], [0], [1], [0, 0, 1, 1], [], []>} : vector<64x128xbf16>, vector<128x128xbf16>, vector<64x128xf32> -> vector<64x128xf32>
    %7 = arith.addf %0, %6 : vector<64x128xf32>
    %c0_7 = arith.constant 0 : index
    %c9 = arith.constant 9 : index
    %c0_8 = arith.constant 0 : index
    %c0_9 = arith.constant 0 : index
    %8 = vector.load %arg1[%c0_7, %c9, %c0_8, %c0_9] : memref<1x36x9x128xbf16, #tpu.memory_space<vmem>>, vector<1x8x8x128xbf16>
    %9 = vector.shape_cast %8 : vector<1x8x8x128xbf16> to vector<8x8x128xbf16>
    %10 = vector.shape_cast %9 : vector<8x8x128xbf16> to vector<64x128xbf16>
    %c1 = arith.constant 1 : index
    %c0_10 = arith.constant 0 : index
    %c0_11 = arith.constant 0 : index
    %11 = vector.load %arg2[%c1, %c0_10, %c0_11] : memref<9x128x128xbf16, #tpu.memory_space<vmem>>, vector<1x128x128xbf16>
    %12 = vector.shape_cast %11 : vector<1x128x128xbf16> to vector<128x128xbf16>
    %cst_12 = arith.constant dense<0.000000e+00> : vector<64x128xf32>
    %13 = tpu.matmul %10, %12, %cst_12 {dimension_numbers = #tpu.dot_dimension_numbers<[1], [0], [0], [1], [0, 0, 1, 1], [], []>} : vector<64x128xbf16>, vector<128x128xbf16>, vector<64x128xf32> -> vector<64x128xf32>
    %14 = arith.addf %7, %13 : vector<64x128xf32>
    %c0_13 = arith.constant 0 : index
    %c0_14 = arith.constant 0 : index
    %c1_15 = arith.constant 1 : index
    %c0_16 = arith.constant 0 : index
    %15 = vector.load %arg1[%c0_13, %c0_14, %c1_15, %c0_16] : memref<1x36x9x128xbf16, #tpu.memory_space<vmem>>, vector<1x8x8x128xbf16>
    %16 = vector.shape_cast %15 : vector<1x8x8x128xbf16> to vector<8x8x128xbf16>
    %17 = vector.shape_cast %16 : vector<8x8x128xbf16> to vector<64x128xbf16>
    %c2 = arith.constant 2 : index
    %c0_17 = arith.constant 0 : index
    %c0_18 = arith.constant 0 : index
    %18 = vector.load %arg2[%c2, %c0_17, %c0_18] : memref<9x128x128xbf16, #tpu.memory_space<vmem>>, vector<1x128x128xbf16>
    %19 = vector.shape_cast %18 : vector<1x128x128xbf16> to vector<128x128xbf16>
    %cst_19 = arith.constant dense<0.000000e+00> : vector<64x128xf32>
    %20 = tpu.matmul %17, %19, %cst_19 {dimension_numbers = #tpu.dot_dimension_numbers<[1], [0], [0], [1], [0, 0, 1, 1], [], []>} : vector<64x128xbf16>, vector<128x128xbf16>, vector<64x128xf32> -> vector<64x128xf32>
    %21 = arith.addf %14, %20 : vector<64x128xf32>
    %c0_20 = arith.constant 0 : index
    %c18 = arith.constant 18 : index
    %c0_21 = arith.constant 0 : index
    %c0_22 = arith.constant 0 : index
    %22 = vector.load %arg1[%c0_20, %c18, %c0_21, %c0_22] : memref<1x36x9x128xbf16, #tpu.memory_space<vmem>>, vector<1x8x8x128xbf16>
    %23 = vector.shape_cast %22 : vector<1x8x8x128xbf16> to vector<8x8x128xbf16>
    %24 = vector.shape_cast %23 : vector<8x8x128xbf16> to vector<64x128xbf16>
    %c3 = arith.constant 3 : index
    %c0_23 = arith.constant 0 : index
    %c0_24 = arith.constant 0 : index
    %25 = vector.load %arg2[%c3, %c0_23, %c0_24] : memref<9x128x128xbf16, #tpu.memory_space<vmem>>, vector<1x128x128xbf16>
    %26 = vector.shape_cast %25 : vector<1x128x128xbf16> to vector<128x128xbf16>
    %cst_25 = arith.constant dense<0.000000e+00> : vector<64x128xf32>
    %27 = tpu.matmul %24, %26, %cst_25 {dimension_numbers = #tpu.dot_dimension_numbers<[1], [0], [0], [1], [0, 0, 1, 1], [], []>} : vector<64x128xbf16>, vector<128x128xbf16>, vector<64x128xf32> -> vector<64x128xf32>
    %28 = arith.addf %21, %27 : vector<64x128xf32>
    %c0_26 = arith.constant 0 : index
    %c27 = arith.constant 27 : index
    %c0_27 = arith.constant 0 : index
    %c0_28 = arith.constant 0 : index
    %29 = vector.load %arg1[%c0_26, %c27, %c0_27, %c0_28] : memref<1x36x9x128xbf16, #tpu.memory_space<vmem>>, vector<1x8x8x128xbf16>
    %30 = vector.shape_cast %29 : vector<1x8x8x128xbf16> to vector<8x8x128xbf16>
    %31 = vector.shape_cast %30 : vector<8x8x128xbf16> to vector<64x128xbf16>
    %c4 = arith.constant 4 : index
    %c0_29 = arith.constant 0 : index
    %c0_30 = arith.constant 0 : index
    %32 = vector.load %arg2[%c4, %c0_29, %c0_30] : memref<9x128x128xbf16, #tpu.memory_space<vmem>>, vector<1x128x128xbf16>
    %33 = vector.shape_cast %32 : vector<1x128x128xbf16> to vector<128x128xbf16>
    %cst_31 = arith.constant dense<0.000000e+00> : vector<64x128xf32>
    %34 = tpu.matmul %31, %33, %cst_31 {dimension_numbers = #tpu.dot_dimension_numbers<[1], [0], [0], [1], [0, 0, 1, 1], [], []>} : vector<64x128xbf16>, vector<128x128xbf16>, vector<64x128xf32> -> vector<64x128xf32>
    %35 = arith.addf %28, %34 : vector<64x128xf32>
    %c0_32 = arith.constant 0 : index
    %c18_33 = arith.constant 18 : index
    %c1_34 = arith.constant 1 : index
    %c0_35 = arith.constant 0 : index
    %36 = vector.load %arg1[%c0_32, %c18_33, %c1_34, %c0_35] : memref<1x36x9x128xbf16, #tpu.memory_space<vmem>>, vector<1x8x8x128xbf16>
    %37 = vector.shape_cast %36 : vector<1x8x8x128xbf16> to vector<8x8x128xbf16>
    %38 = vector.shape_cast %37 : vector<8x8x128xbf16> to vector<64x128xbf16>
    %c5 = arith.constant 5 : index
    %c0_36 = arith.constant 0 : index
    %c0_37 = arith.constant 0 : index
    %39 = vector.load %arg2[%c5, %c0_36, %c0_37] : memref<9x128x128xbf16, #tpu.memory_space<vmem>>, vector<1x128x128xbf16>
    %40 = vector.shape_cast %39 : vector<1x128x128xbf16> to vector<128x128xbf16>
    %cst_38 = arith.constant dense<0.000000e+00> : vector<64x128xf32>
    %41 = tpu.matmul %38, %40, %cst_38 {dimension_numbers = #tpu.dot_dimension_numbers<[1], [0], [0], [1], [0, 0, 1, 1], [], []>} : vector<64x128xbf16>, vector<128x128xbf16>, vector<64x128xf32> -> vector<64x128xf32>
    %42 = arith.addf %35, %41 : vector<64x128xf32>
    %c0_39 = arith.constant 0 : index
    %c1_40 = arith.constant 1 : index
    %c0_41 = arith.constant 0 : index
    %c0_42 = arith.constant 0 : index
    %43 = vector.load %arg1[%c0_39, %c1_40, %c0_41, %c0_42] : memref<1x36x9x128xbf16, #tpu.memory_space<vmem>>, vector<1x8x8x128xbf16>
    %44 = vector.shape_cast %43 : vector<1x8x8x128xbf16> to vector<8x8x128xbf16>
    %45 = vector.shape_cast %44 : vector<8x8x128xbf16> to vector<64x128xbf16>
    %c6 = arith.constant 6 : index
    %c0_43 = arith.constant 0 : index
    %c0_44 = arith.constant 0 : index
    %46 = vector.load %arg2[%c6, %c0_43, %c0_44] : memref<9x128x128xbf16, #tpu.memory_space<vmem>>, vector<1x128x128xbf16>
    %47 = vector.shape_cast %46 : vector<1x128x128xbf16> to vector<128x128xbf16>
    %cst_45 = arith.constant dense<0.000000e+00> : vector<64x128xf32>
    %48 = tpu.matmul %45, %47, %cst_45 {dimension_numbers = #tpu.dot_dimension_numbers<[1], [0], [0], [1], [0, 0, 1, 1], [], []>} : vector<64x128xbf16>, vector<128x128xbf16>, vector<64x128xf32> -> vector<64x128xf32>
    %49 = arith.addf %42, %48 : vector<64x128xf32>
    %c0_46 = arith.constant 0 : index
    %c10 = arith.constant 10 : index
    %c0_47 = arith.constant 0 : index
    %c0_48 = arith.constant 0 : index
    %50 = vector.load %arg1[%c0_46, %c10, %c0_47, %c0_48] : memref<1x36x9x128xbf16, #tpu.memory_space<vmem>>, vector<1x8x8x128xbf16>
    %51 = vector.shape_cast %50 : vector<1x8x8x128xbf16> to vector<8x8x128xbf16>
    %52 = vector.shape_cast %51 : vector<8x8x128xbf16> to vector<64x128xbf16>
    %c7 = arith.constant 7 : index
    %c0_49 = arith.constant 0 : index
    %c0_50 = arith.constant 0 : index
    %53 = vector.load %arg2[%c7, %c0_49, %c0_50] : memref<9x128x128xbf16, #tpu.memory_space<vmem>>, vector<1x128x128xbf16>
    %54 = vector.shape_cast %53 : vector<1x128x128xbf16> to vector<128x128xbf16>
    %cst_51 = arith.constant dense<0.000000e+00> : vector<64x128xf32>
    %55 = tpu.matmul %52, %54, %cst_51 {dimension_numbers = #tpu.dot_dimension_numbers<[1], [0], [0], [1], [0, 0, 1, 1], [], []>} : vector<64x128xbf16>, vector<128x128xbf16>, vector<64x128xf32> -> vector<64x128xf32>
    %56 = arith.addf %49, %55 : vector<64x128xf32>
    %c0_52 = arith.constant 0 : index
    %c1_53 = arith.constant 1 : index
    %c1_54 = arith.constant 1 : index
    %c0_55 = arith.constant 0 : index
    %57 = vector.load %arg1[%c0_52, %c1_53, %c1_54, %c0_55] : memref<1x36x9x128xbf16, #tpu.memory_space<vmem>>, vector<1x8x8x128xbf16>
    %58 = vector.shape_cast %57 : vector<1x8x8x128xbf16> to vector<8x8x128xbf16>
    %59 = vector.shape_cast %58 : vector<8x8x128xbf16> to vector<64x128xbf16>
    %c8 = arith.constant 8 : index
    %c0_56 = arith.constant 0 : index
    %c0_57 = arith.constant 0 : index
    %60 = vector.load %arg2[%c8, %c0_56, %c0_57] : memref<9x128x128xbf16, #tpu.memory_space<vmem>>, vector<1x128x128xbf16>
    %61 = vector.shape_cast %60 : vector<1x128x128xbf16> to vector<128x128xbf16>
    %cst_58 = arith.constant dense<0.000000e+00> : vector<64x128xf32>
    %62 = tpu.matmul %59, %61, %cst_58 {dimension_numbers = #tpu.dot_dimension_numbers<[1], [0], [0], [1], [0, 0, 1, 1], [], []>} : vector<64x128xbf16>, vector<128x128xbf16>, vector<64x128xf32> -> vector<64x128xf32>
    %63 = arith.addf %56, %62 : vector<64x128xf32>
    %c0_59 = arith.constant 0 : index
    %c0_60 = arith.constant 0 : index
    %64 = vector.load %arg3[%c0_59, %c0_60] : memref<1x128xf32, #tpu.memory_space<vmem>>, vector<1x128xf32>
    %65 = vector.broadcast %64 : vector<1x128xf32> to vector<64x128xf32>
    %66 = arith.mulf %63, %65 : vector<64x128xf32>
    %c0_61 = arith.constant 0 : index
    %c0_62 = arith.constant 0 : index
    %67 = vector.load %arg4[%c0_61, %c0_62] : memref<1x128xf32, #tpu.memory_space<vmem>>, vector<1x128xf32>
    %68 = vector.broadcast %67 : vector<1x128xf32> to vector<64x128xf32>
    %69 = arith.addf %66, %68 : vector<64x128xf32>
    %cst_63 = arith.constant 0.000000e+00 : f32
    %70 = vector.broadcast %cst_63 : f32 to vector<64x128xf32>
    %71 = arith.maximumf %69, %70 : vector<64x128xf32>
    %cst_64 = arith.constant 0.000000e+00 : bf16
    %72 = vector.broadcast %cst_64 : bf16 to vector<10x10x128xbf16>
    %c0_65 = arith.constant 0 : index
    %c0_66 = arith.constant 0 : index
    %c0_67 = arith.constant 0 : index
    %73 = vector.load %arg12[%c0_65, %c0_66, %c0_67] : memref<10x10x128xbf16, #tpu.memory_space<vmem>>, vector<10x10x128xbf16>
    tpu.vector_store %arg12[%c0_65, %c0_66, %c0_67], %72 {strides = array<i32>} : memref<10x10x128xbf16, #tpu.memory_space<vmem>>, vector<10x10x128xbf16>,
    %74 = arith.truncf %71 : vector<64x128xf32> to vector<64x128xbf16>
    %75 = vector.shape_cast %74 : vector<64x128xbf16> to vector<8x8x128xbf16>
    %c1_68 = arith.constant 1 : index
    %c1_69 = arith.constant 1 : index
    %c0_70 = arith.constant 0 : index
    %76 = vector.load %arg12[%c1_68, %c1_69, %c0_70] : memref<10x10x128xbf16, #tpu.memory_space<vmem>>, vector<8x8x128xbf16>
    tpu.vector_store %arg12[%c1_68, %c1_69, %c0_70], %75 {strides = array<i32>} : memref<10x10x128xbf16, #tpu.memory_space<vmem>>, vector<8x8x128xbf16>,
    %c0_71 = arith.constant 0 : index
    %c27_72 = arith.constant 27 : index
    %c0_73 = arith.constant 0 : index
    %c0_74 = arith.constant 0 : index
    %77 = vector.load %arg1[%c0_71, %c27_72, %c0_73, %c0_74] : memref<1x36x9x128xbf16, #tpu.memory_space<vmem>>, vector<1x8x8x128xbf16>
    %78 = vector.shape_cast %77 : vector<1x8x8x128xbf16> to vector<8x8x128xbf16>
    %79 = vector.shape_cast %78 : vector<8x8x128xbf16> to vector<64x128xbf16>
    %c0_75 = arith.constant 0 : index
    %c0_76 = arith.constant 0 : index
    %80 = vector.load %arg8[%c0_75, %c0_76] : memref<128x128xbf16, #tpu.memory_space<vmem>>, vector<128x128xbf16>
    %cst_77 = arith.constant dense<0.000000e+00> : vector<64x128xf32>
    %81 = tpu.matmul %79, %80, %cst_77 {dimension_numbers = #tpu.dot_dimension_numbers<[1], [0], [0], [1], [0, 0, 1, 1], [], []>} : vector<64x128xbf16>, vector<128x128xbf16>, vector<64x128xf32> -> vector<64x128xf32>
    %c0_78 = arith.constant 0 : index
    %c0_79 = arith.constant 0 : index
    %82 = vector.load %arg9[%c0_78, %c0_79] : memref<1x128xf32, #tpu.memory_space<vmem>>, vector<1x128xf32>
    %83 = vector.broadcast %82 : vector<1x128xf32> to vector<64x128xf32>
    %84 = arith.mulf %81, %83 : vector<64x128xf32>
    %c0_80 = arith.constant 0 : index
    %c0_81 = arith.constant 0 : index
    %85 = vector.load %arg10[%c0_80, %c0_81] : memref<1x128xf32, #tpu.memory_space<vmem>>, vector<1x128xf32>
    %86 = vector.broadcast %85 : vector<1x128xf32> to vector<64x128xf32>
    %87 = arith.addf %84, %86 : vector<64x128xf32>
    %cst_82 = arith.constant 0.000000e+00 : f32
    %88 = vector.broadcast %cst_82 : f32 to vector<64x128xf32>
    %c0_83 = arith.constant 0 : index
    %c0_84 = arith.constant 0 : index
    %c0_85 = arith.constant 0 : index
    %89 = vector.load %arg12[%c0_83, %c0_84, %c0_85] : memref<10x10x128xbf16, #tpu.memory_space<vmem>>, vector<8x8x128xbf16>
    %90 = vector.shape_cast %89 : vector<8x8x128xbf16> to vector<64x128xbf16>
    %c0_86 = arith.constant 0 : index
    %c0_87 = arith.constant 0 : index
    %c0_88 = arith.constant 0 : index
    %91 = vector.load %arg5[%c0_86, %c0_87, %c0_88] : memref<9x128x128xbf16, #tpu.memory_space<vmem>>, vector<1x128x128xbf16>
    %92 = vector.shape_cast %91 : vector<1x128x128xbf16> to vector<128x128xbf16>
    %cst_89 = arith.constant dense<0.000000e+00> : vector<64x128xf32>
    %93 = tpu.matmul %90, %92, %cst_89 {dimension_numbers = #tpu.dot_dimension_numbers<[1], [0], [0], [1], [0, 0, 1, 1], [], []>} : vector<64x128xbf16>, vector<128x128xbf16>, vector<64x128xf32> -> vector<64x128xf32>
    %94 = arith.addf %88, %93 : vector<64x128xf32>
    %c0_90 = arith.constant 0 : index
    %c1_91 = arith.constant 1 : index
    %c0_92 = arith.constant 0 : index
    %95 = vector.load %arg12[%c0_90, %c1_91, %c0_92] : memref<10x10x128xbf16, #tpu.memory_space<vmem>>, vector<8x8x128xbf16>
    %96 = vector.shape_cast %95 : vector<8x8x128xbf16> to vector<64x128xbf16>
    %c1_93 = arith.constant 1 : index
    %c0_94 = arith.constant 0 : index
    %c0_95 = arith.constant 0 : index
    %97 = vector.load %arg5[%c1_93, %c0_94, %c0_95] : memref<9x128x128xbf16, #tpu.memory_space<vmem>>, vector<1x128x128xbf16>
    %98 = vector.shape_cast %97 : vector<1x128x128xbf16> to vector<128x128xbf16>
    %cst_96 = arith.constant dense<0.000000e+00> : vector<64x128xf32>
    %99 = tpu.matmul %96, %98, %cst_96 {dimension_numbers = #tpu.dot_dimension_numbers<[1], [0], [0], [1], [0, 0, 1, 1], [], []>} : vector<64x128xbf16>, vector<128x128xbf16>, vector<64x128xf32> -> vector<64x128xf32>
    %100 = arith.addf %94, %99 : vector<64x128xf32>
    %c0_97 = arith.constant 0 : index
    %c2_98 = arith.constant 2 : index
    %c0_99 = arith.constant 0 : index
    %101 = vector.load %arg12[%c0_97, %c2_98, %c0_99] : memref<10x10x128xbf16, #tpu.memory_space<vmem>>, vector<8x8x128xbf16>
    %102 = vector.shape_cast %101 : vector<8x8x128xbf16> to vector<64x128xbf16>
    %c2_100 = arith.constant 2 : index
    %c0_101 = arith.constant 0 : index
    %c0_102 = arith.constant 0 : index
    %103 = vector.load %arg5[%c2_100, %c0_101, %c0_102] : memref<9x128x128xbf16, #tpu.memory_space<vmem>>, vector<1x128x128xbf16>
    %104 = vector.shape_cast %103 : vector<1x128x128xbf16> to vector<128x128xbf16>
    %cst_103 = arith.constant dense<0.000000e+00> : vector<64x128xf32>
    %105 = tpu.matmul %102, %104, %cst_103 {dimension_numbers = #tpu.dot_dimension_numbers<[1], [0], [0], [1], [0, 0, 1, 1], [], []>} : vector<64x128xbf16>, vector<128x128xbf16>, vector<64x128xf32> -> vector<64x128xf32>
    %106 = arith.addf %100, %105 : vector<64x128xf32>
    %c1_104 = arith.constant 1 : index
    %c0_105 = arith.constant 0 : index
    %c0_106 = arith.constant 0 : index
    %107 = vector.load %arg12[%c1_104, %c0_105, %c0_106] : memref<10x10x128xbf16, #tpu.memory_space<vmem>>, vector<8x8x128xbf16>
    %108 = vector.shape_cast %107 : vector<8x8x128xbf16> to vector<64x128xbf16>
    %c3_107 = arith.constant 3 : index
    %c0_108 = arith.constant 0 : index
    %c0_109 = arith.constant 0 : index
    %109 = vector.load %arg5[%c3_107, %c0_108, %c0_109] : memref<9x128x128xbf16, #tpu.memory_space<vmem>>, vector<1x128x128xbf16>
    %110 = vector.shape_cast %109 : vector<1x128x128xbf16> to vector<128x128xbf16>
    %cst_110 = arith.constant dense<0.000000e+00> : vector<64x128xf32>
    %111 = tpu.matmul %108, %110, %cst_110 {dimension_numbers = #tpu.dot_dimension_numbers<[1], [0], [0], [1], [0, 0, 1, 1], [], []>} : vector<64x128xbf16>, vector<128x128xbf16>, vector<64x128xf32> -> vector<64x128xf32>
    %112 = arith.addf %106, %111 : vector<64x128xf32>
    %c1_111 = arith.constant 1 : index
    %c1_112 = arith.constant 1 : index
    %c0_113 = arith.constant 0 : index
    %113 = vector.load %arg12[%c1_111, %c1_112, %c0_113] : memref<10x10x128xbf16, #tpu.memory_space<vmem>>, vector<8x8x128xbf16>
    %114 = vector.shape_cast %113 : vector<8x8x128xbf16> to vector<64x128xbf16>
    %c4_114 = arith.constant 4 : index
    %c0_115 = arith.constant 0 : index
    %c0_116 = arith.constant 0 : index
    %115 = vector.load %arg5[%c4_114, %c0_115, %c0_116] : memref<9x128x128xbf16, #tpu.memory_space<vmem>>, vector<1x128x128xbf16>
    %116 = vector.shape_cast %115 : vector<1x128x128xbf16> to vector<128x128xbf16>
    %cst_117 = arith.constant dense<0.000000e+00> : vector<64x128xf32>
    %117 = tpu.matmul %114, %116, %cst_117 {dimension_numbers = #tpu.dot_dimension_numbers<[1], [0], [0], [1], [0, 0, 1, 1], [], []>} : vector<64x128xbf16>, vector<128x128xbf16>, vector<64x128xf32> -> vector<64x128xf32>
    %118 = arith.addf %112, %117 : vector<64x128xf32>
    %c1_118 = arith.constant 1 : index
    %c2_119 = arith.constant 2 : index
    %c0_120 = arith.constant 0 : index
    %119 = vector.load %arg12[%c1_118, %c2_119, %c0_120] : memref<10x10x128xbf16, #tpu.memory_space<vmem>>, vector<8x8x128xbf16>
    %120 = vector.shape_cast %119 : vector<8x8x128xbf16> to vector<64x128xbf16>
    %c5_121 = arith.constant 5 : index
    %c0_122 = arith.constant 0 : index
    %c0_123 = arith.constant 0 : index
    %121 = vector.load %arg5[%c5_121, %c0_122, %c0_123] : memref<9x128x128xbf16, #tpu.memory_space<vmem>>, vector<1x128x128xbf16>
    %122 = vector.shape_cast %121 : vector<1x128x128xbf16> to vector<128x128xbf16>
    %cst_124 = arith.constant dense<0.000000e+00> : vector<64x128xf32>
    %123 = tpu.matmul %120, %122, %cst_124 {dimension_numbers = #tpu.dot_dimension_numbers<[1], [0], [0], [1], [0, 0, 1, 1], [], []>} : vector<64x128xbf16>, vector<128x128xbf16>, vector<64x128xf32> -> vector<64x128xf32>
    %124 = arith.addf %118, %123 : vector<64x128xf32>
    %c2_125 = arith.constant 2 : index
    %c0_126 = arith.constant 0 : index
    %c0_127 = arith.constant 0 : index
    %125 = vector.load %arg12[%c2_125, %c0_126, %c0_127] : memref<10x10x128xbf16, #tpu.memory_space<vmem>>, vector<8x8x128xbf16>
    %126 = vector.shape_cast %125 : vector<8x8x128xbf16> to vector<64x128xbf16>
    %c6_128 = arith.constant 6 : index
    %c0_129 = arith.constant 0 : index
    %c0_130 = arith.constant 0 : index
    %127 = vector.load %arg5[%c6_128, %c0_129, %c0_130] : memref<9x128x128xbf16, #tpu.memory_space<vmem>>, vector<1x128x128xbf16>
    %128 = vector.shape_cast %127 : vector<1x128x128xbf16> to vector<128x128xbf16>
    %cst_131 = arith.constant dense<0.000000e+00> : vector<64x128xf32>
    %129 = tpu.matmul %126, %128, %cst_131 {dimension_numbers = #tpu.dot_dimension_numbers<[1], [0], [0], [1], [0, 0, 1, 1], [], []>} : vector<64x128xbf16>, vector<128x128xbf16>, vector<64x128xf32> -> vector<64x128xf32>
    %130 = arith.addf %124, %129 : vector<64x128xf32>
    %c2_132 = arith.constant 2 : index
    %c1_133 = arith.constant 1 : index
    %c0_134 = arith.constant 0 : index
    %131 = vector.load %arg12[%c2_132, %c1_133, %c0_134] : memref<10x10x128xbf16, #tpu.memory_space<vmem>>, vector<8x8x128xbf16>
    %132 = vector.shape_cast %131 : vector<8x8x128xbf16> to vector<64x128xbf16>
    %c7_135 = arith.constant 7 : index
    %c0_136 = arith.constant 0 : index
    %c0_137 = arith.constant 0 : index
    %133 = vector.load %arg5[%c7_135, %c0_136, %c0_137] : memref<9x128x128xbf16, #tpu.memory_space<vmem>>, vector<1x128x128xbf16>
    %134 = vector.shape_cast %133 : vector<1x128x128xbf16> to vector<128x128xbf16>
    %cst_138 = arith.constant dense<0.000000e+00> : vector<64x128xf32>
    %135 = tpu.matmul %132, %134, %cst_138 {dimension_numbers = #tpu.dot_dimension_numbers<[1], [0], [0], [1], [0, 0, 1, 1], [], []>} : vector<64x128xbf16>, vector<128x128xbf16>, vector<64x128xf32> -> vector<64x128xf32>
    %136 = arith.addf %130, %135 : vector<64x128xf32>
    %c2_139 = arith.constant 2 : index
    %c2_140 = arith.constant 2 : index
    %c0_141 = arith.constant 0 : index
    %137 = vector.load %arg12[%c2_139, %c2_140, %c0_141] : memref<10x10x128xbf16, #tpu.memory_space<vmem>>, vector<8x8x128xbf16>
    %138 = vector.shape_cast %137 : vector<8x8x128xbf16> to vector<64x128xbf16>
    %c8_142 = arith.constant 8 : index
    %c0_143 = arith.constant 0 : index
    %c0_144 = arith.constant 0 : index
    %139 = vector.load %arg5[%c8_142, %c0_143, %c0_144] : memref<9x128x128xbf16, #tpu.memory_space<vmem>>, vector<1x128x128xbf16>
    %140 = vector.shape_cast %139 : vector<1x128x128xbf16> to vector<128x128xbf16>
    %cst_145 = arith.constant dense<0.000000e+00> : vector<64x128xf32>
    %141 = tpu.matmul %138, %140, %cst_145 {dimension_numbers = #tpu.dot_dimension_numbers<[1], [0], [0], [1], [0, 0, 1, 1], [], []>} : vector<64x128xbf16>, vector<128x128xbf16>, vector<64x128xf32> -> vector<64x128xf32>
    %142 = arith.addf %136, %141 : vector<64x128xf32>
    %c0_146 = arith.constant 0 : index
    %c0_147 = arith.constant 0 : index
    %143 = vector.load %arg6[%c0_146, %c0_147] : memref<1x128xf32, #tpu.memory_space<vmem>>, vector<1x128xf32>
    %144 = vector.broadcast %143 : vector<1x128xf32> to vector<64x128xf32>
    %145 = arith.mulf %142, %144 : vector<64x128xf32>
    %c0_148 = arith.constant 0 : index
    %c0_149 = arith.constant 0 : index
    %146 = vector.load %arg7[%c0_148, %c0_149] : memref<1x128xf32, #tpu.memory_space<vmem>>, vector<1x128xf32>
    %147 = vector.broadcast %146 : vector<1x128xf32> to vector<64x128xf32>
    %148 = arith.addf %145, %147 : vector<64x128xf32>
    %149 = arith.addf %148, %87 : vector<64x128xf32>
    %cst_150 = arith.constant 0.000000e+00 : f32
    %150 = vector.broadcast %cst_150 : f32 to vector<64x128xf32>
    %151 = arith.maximumf %149, %150 : vector<64x128xf32>
    %152 = vector.shape_cast %151 : vector<64x128xf32> to vector<8x8x128xf32>
    %c0_151 = arith.constant 0 : index
    %c0_152 = arith.constant 0 : index
    %c0_153 = arith.constant 0 : index
    %c0_154 = arith.constant 0 : index
    %153 = vector.load %arg11[%c0_151, %c0_152, %c0_153, %c0_154] : memref<1x8x8x128xf32, #tpu.memory_space<vmem>>, vector<1x8x8x128xf32>
    %154 = vector.shape_cast %153 : vector<1x8x8x128xf32> to vector<8x8x128xf32>
    %155 = vector.shape_cast %152 : vector<8x8x128xf32> to vector<1x8x8x128xf32>
    tpu.vector_store %arg11[%c0_151, %c0_152, %c0_153, %c0_154], %155 {strides = array<i32>} : memref<1x8x8x128xf32, #tpu.memory_space<vmem>>, vector<1x8x8x128xf32>,
    return
  }
  func.func @transform_0(%arg0: i32) -> (i32, i32, i32, i32) {
    %c0_i32 = arith.constant 0 : i32
    %c0_i32_0 = arith.constant 0 : i32
    %c0_i32_1 = arith.constant 0 : i32
    %c0_i32_2 = arith.constant 0 : i32
    return %arg0, %c0_i32, %c0_i32_0, %c0_i32_1 : i32, i32, i32, i32
  }
  func.func @transform_1(%arg0: i32) -> (i32, i32, i32) {
    %c0_i32 = arith.constant 0 : i32
    %c0_i32_0 = arith.constant 0 : i32
    %c0_i32_1 = arith.constant 0 : i32
    %c0_i32_2 = arith.constant 0 : i32
    return %c0_i32, %c0_i32_0, %c0_i32_1 : i32, i32, i32
  }
  func.func @transform_2(%arg0: i32) -> (i32, i32) {
    %c0_i32 = arith.constant 0 : i32
    %c0_i32_0 = arith.constant 0 : i32
    %c0_i32_1 = arith.constant 0 : i32
    return %c0_i32, %c0_i32_0 : i32, i32
  }
  func.func @transform_3(%arg0: i32) -> (i32, i32) {
    %c0_i32 = arith.constant 0 : i32
    %c0_i32_0 = arith.constant 0 : i32
    %c0_i32_1 = arith.constant 0 : i32
    return %c0_i32, %c0_i32_0 : i32, i32
  }
  func.func @transform_4(%arg0: i32) -> (i32, i32, i32) {
    %c0_i32 = arith.constant 0 : i32
    %c0_i32_0 = arith.constant 0 : i32
    %c0_i32_1 = arith.constant 0 : i32
    %c0_i32_2 = arith.constant 0 : i32
    return %c0_i32, %c0_i32_0, %c0_i32_1 : i32, i32, i32
  }
  func.func @transform_5(%arg0: i32) -> (i32, i32) {
    %c0_i32 = arith.constant 0 : i32
    %c0_i32_0 = arith.constant 0 : i32
    %c0_i32_1 = arith.constant 0 : i32
    return %c0_i32, %c0_i32_0 : i32, i32
  }
  func.func @transform_6(%arg0: i32) -> (i32, i32) {
    %c0_i32 = arith.constant 0 : i32
    %c0_i32_0 = arith.constant 0 : i32
    %c0_i32_1 = arith.constant 0 : i32
    return %c0_i32, %c0_i32_0 : i32, i32
  }
  func.func @transform_7(%arg0: i32) -> (i32, i32) {
    %c0_i32 = arith.constant 0 : i32
    %c0_i32_0 = arith.constant 0 : i32
    %c0_i32_1 = arith.constant 0 : i32
    return %c0_i32, %c0_i32_0 : i32, i32
  }
  func.func @transform_8(%arg0: i32) -> (i32, i32) {
    %c0_i32 = arith.constant 0 : i32
    %c0_i32_0 = arith.constant 0 : i32
    %c0_i32_1 = arith.constant 0 : i32
    return %c0_i32, %c0_i32_0 : i32, i32
  }
  func.func @transform_9(%arg0: i32) -> (i32, i32) {
    %c0_i32 = arith.constant 0 : i32
    %c0_i32_0 = arith.constant 0 : i32
    %c0_i32_1 = arith.constant 0 : i32
    return %c0_i32, %c0_i32_0 : i32, i32
  }
  func.func @transform_10(%arg0: i32) -> (i32, i32, i32, i32) {
    %c0_i32 = arith.constant 0 : i32
    %c0_i32_0 = arith.constant 0 : i32
    %c0_i32_1 = arith.constant 0 : i32
    %c0_i32_2 = arith.constant 0 : i32
    return %arg0, %c0_i32, %c0_i32_0, %c0_i32_1 : i32, i32, i32, i32
  }
}

</mosaic_0001>

<bundles_post_ra>
// kernel: _forward_impl.1
= control target key start
LH: loop header
LB: loop body
LE: loop exit
PB: predicated region body
PF: predicated region fallthrough
CT: control target
= control target key end

     0   :  { %s6423_s13 = smov 0   ;;  %s7435_s0 = inlined_call_operand.vmem [shape: bf16[2,36,9,128], index: 0, kind: input, shape index: {}]   ;;  %s7436_s1 = inlined_call_operand.vmem [shape: bf16[9,128,128], index: 1, kind: input, shape index: {}]   ;;  %s7437_s2 = inlined_call_operand.vmem [shape: f32[1,128], index: 2, kind: input, shape index: {}]   ;;  %s7438_s3 = inlined_call_operand.vmem [shape: f32[1,128], index: 3, kind: input, shape index: {}]   ;;  %s7439_s4 = inlined_call_operand.vmem [shape: bf16[9,128,128], index: 4, kind: input, shape index: {}]   ;;  %s7440_s5 = inlined_call_operand.vmem [shape: f32[1,128], index: 5, kind: input, shape index: {}]   ;;  %s7441_s6 = inlined_call_operand.vmem [shape: f32[1,128], index: 6, kind: input, shape index: {}]   ;;  %s7442_s7 = inlined_call_operand.vmem [shape: bf16[128,128], index: 7, kind: input, shape index: {}]   ;;  %s7443_s8 = inlined_call_operand.vmem [shape: f32[1,128], index: 8, kind: input, shape index: {}]   ;;  %s7444_s9 = inlined_call_operand.vmem [shape: f32[1,128], index: 9, kind: input, shape index: {}]   ;;  %s7445_s10 = inlined_call_operand.vmem [shape: f32[2,8,8,128], index: 10, kind: output, shape index: {}]  }
   0x1 LB: > { %s4700_s14 = sadd.s32 4294967295, %s6365_s13   ;;  %p4704_p0 = scmp.ge.s32.totalorder %s6365_s13, 1  ;;  %s6365_s13 = sphi %s6423_s13, %s20_s13  }
   0x2   : > { %p312_p1 = scmp.lt.s32.totalorder %s6365_s13, 3 }
   0x4   : > { %p313_p2 = pnand %p4704_p0, %p312_p1 }
   0x5   : > { %v6159_v0 = vld [vmem:[%s7436_s1 + $0x40] sm:$0xff] (!%p313_p2)   ;;  %p350_p3 = scmp.lt.s32.totalorder (!%p313_p2), %s4700_s14, 1  ;;  %v6160_v1 = vld [vmem:[%s7436_s1 + $0x48] sm:$0xff] (!%p313_p2)   ;;  %v6161_v2 = vld [vmem:[%s7436_s1 + $0x50] sm:$0xff] (!%p313_p2)   ;;  %vm701_vm0 = vsmask.f32 (!%p313_p2), 3328 }
   0x6   : > { %316 = sbr.rel (%p313_p2) target bundleno = 1032 (0x408), region = 60  ;;  %5549 = vmatprep.subr.bf16.mxu0 (!%p313_p2), %v6159_v0  ;;  %v6162_v3 = vld [vmem:[%s7436_s1 + $0x58] sm:$0xff] (!%p313_p2)   ;;  %v6163_v5 = vld [vmem:[%s7436_s1 + $0x60] sm:$0xff] (!%p313_p2)   ;;  %v6164_v6 = vld [vmem:[%s7436_s1 + $0x68] sm:$0xff] (!%p313_p2)   ;;  %vm702_vm1 = vsmask.f32 (!%p313_p2), 7440 }
   0x7   : > { %5550 = vmatpush3.bf16.msra.mxu0 (!%p313_p2), %v6159_v0  ;;  %v6165_v7 = vld [vmem:[%s7436_s1 + $0x70] sm:$0xff] (!%p313_p2)   ;;  %v6166_v8 = vld [vmem:[%s7436_s1 + $0x78] sm:$0xff] (!%p313_p2)   ;;  %v6168_v9 = vld [vmem:[%s7436_s1] sm:$0xff] (!%p313_p2)   ;;  %vm2381_vm3 = vcmask (!%p313_p2), 1043456   ;;  %vm2382_vm4 = vsmask.f32 (!%p313_p2), 7938 }
   0x8   : > { %5551 = vmatprep.subr.bf16.mxu0 (!%p313_p2), %v6160_v1  ;;  %v6170_v12 = vld [vmem:[%s7436_s1 + $0x8] sm:$0xff] (!%p313_p2)   ;;  %v6171_v13 = vld [vmem:[%s7436_s1 + $0x10] sm:$0xff] (!%p313_p2)   ;;  %v6172_v16 = vld [vmem:[%s7436_s1 + $0x18] sm:$0xff] (!%p313_p2)   ;;  %vm2387_vm5 = vcmask (!%p313_p2), 1040384   ;;  %vm2388_vm6 = vsmask.f32 (!%p313_p2), 256 }
   0x9   : > { %v6173_v17 = vld [vmem:[%s7436_s1 + $0x20] sm:$0xff] (!%p313_p2)   ;;  %v6174_v18 = vld [vmem:[%s7436_s1 + $0x28] sm:$0xff] (!%p313_p2)   ;;  %v6176_v23 = vld [vmem:[%s7436_s1 + $0x30] sm:$0xff] (!%p313_p2)   ;;  %vm3077_vm9 = vcmask (!%p313_p2), 1042432   ;;  %vm3078_vm10 = vcmask (!%p313_p2), 1046532  }
   0xa   : > { %v6178_v27 = vld [vmem:[%s7436_s1 + $0x38] sm:$0xff] (!%p313_p2)   ;;  %v6180_v33 = vld [vmem:[%s7436_s1 + $0x80] sm:$0xff] (!%p313_p2)   ;;  %v6182_v40 = vld [vmem:[%s7436_s1 + $0x88] sm:$0xff] (!%p313_p2)  }
   0xb   : > { %5552 = vmatpush3.bf16.msra.mxu0 (!%p313_p2), %v6160_v1  ;;  %vm6506_vm2 = vmor (!%p313_p2), %vm701_vm0, %vm702_vm1  ;;  %v6183_v50 = vld [vmem:[%s7436_s1 + $0x90] sm:$0xff] (!%p313_p2)   ;;  %v6184_v54 = vld [vmem:[%s7436_s1 + $0x98] sm:$0xff] (!%p313_p2)  }
   0xc   : > { %5553 = vmatprep.subr.bf16.mxu0 (!%p313_p2), %v6161_v2  ;;  %v6185_v0 = vld [vmem:[%s7436_s1 + $0xa0] sm:$0xff] (!%p313_p2)   ;;  %vm6895_vm7 = vmand (!%p313_p2), %vm2381_vm3, %vm2382_vm4  ;;  %v6354_v46 = vld [vmem:[%s7439_s4 + $0x218] sm:$0xff] (!%p313_p2)  }
   0xd   : > { %s7455_s14 = smov (!%p350_p3, %s4700_s14), 1  ;;  %vm6902_vm8 = vmand %vm2387_vm5, %vm2388_vm6 }
   0xe   : > { %s6149_s21 = smul.u32 288, %s7455_s14  ;;  %vm6935_vm11 = vmor %vm3077_vm9, %vm3078_vm10  ;;  %s5312_s19 = sshll.u32 %s7455_s14, 6 }
   0xf   : > { %5554 = vmatpush3.bf16.msra.mxu0 %v6161_v2 }
  0x10   : > { %s6446_s24 = scalar_lea.vmem %s7435_s0, %s6149_s21  ;;  %5555 = vmatprep.subr.bf16.mxu0 %v6162_v3  ;;  %s7418_s21 = scalar_lea.vmem %s7445_s10, %s5312_s19 }
  0x11   : > { %v6167_v4 = vld [vmem:[%s6446_s24 + $0x48] ss:$8 sps:$4 sm:$0xff]   ;;  %v6169_v10 = vld [vmem:[%s6446_s24 + $0x58] ss:$8 sps:$4 sm:$0xff]   ;;  %v686_v26 = vld [vmem:[%s6446_s24 + $0x4] sm:$0x1] }
  0x12   : > { %5565 = vmatprep.mubr.bf16.mxu0 %v6167_v4  ;;  %v6175_v11 = vld [vmem:[%s6446_s24 + $0x68] ss:$8 sps:$4 sm:$0xff]   ;;  %v6177_v14 = vld [vmem:[%s6446_s24 + $0x78] ss:$8 sps:$4 sm:$0xff]   ;;  %v688_v28 = vld [vmem:[%s6446_s24 + $0xc] sm:$0x1] }
  0x13   : > { %5556 = vmatpush3.bf16.msra.mxu0 %v6162_v3  ;;  %v6179_v15 = vld [vmem:[%s6446_s24] ss:$8 sps:$4 sm:$0xff]   ;;  %v714_v34 = vshll.u32 %v686_v26, 16  ;;  %v728_v35 = vshll.u32 %v688_v28, 16  ;;  %v6181_v36 = vld [vmem:[%s6446_s24 + $0x10] ss:$8 sps:$4 sm:$0xff]  }
  0x14   : > { %5557 = vmatprep.subr.bf16.mxu0 %v6163_v5  ;;  %v685_v19 = vld [vmem:[%s6446_s24] sm:$0xf]  ;;  %v687_v20 = vld [vmem:[%s6446_s24 + $0x8] sm:$0xf]  ;;  %v689_v41 = vld [vmem:[%s6446_s24 + $0x10] sm:$0xf] }
  0x15   : > { %v705_v21 = vshrl.u32 %v685_v19, 16  ;;  %v708_v22 = vshll.u32 %v685_v19, 16  ;;  %v719_v24 = vshrl.u32 %v687_v20, 16  ;;  %v722_v25 = vshll.u32 %v687_v20, 16  ;;  %v6187_v39 = vld [vmem:[%s6446_s24 + $0x20] ss:$8 sps:$4 sm:$0xff]  }
  0x16   : > { %v716_v42 = vrot.slane %v714_v34, 5  ;;  %v730_v43 = vrot.slane %v728_v35, 5  ;;  %v691_v47 = vld [vmem:[%s6446_s24 + $0x18] sm:$0xf]  ;;  %v733_v48 = vshrl.u32 %v689_v41, 16  ;;  %v736_v49 = vshll.u32 %v689_v41, 16 }
  0x17   : > { %5558 = vmatpush3.bf16.msra.mxu0 %v6163_v5  ;;  %v707_v29 = vrot.slane %v705_v21, 4  ;;  %v710_v30 = vrot.slane %v708_v22, 5  ;;  %v721_v31 = vrot.slane %v719_v24, 4  ;;  %v724_v32 = vrot.slane %v722_v25, 5  ;;  %v6189_v53 = vld [vmem:[%s6446_s24 + $0x30] ss:$8 sps:$4 sm:$0xff]  }
  0x18   : > { %5559 = vmatprep.subr.bf16.mxu0 %v6164_v6  ;;  %v747_v55 = vshrl.u32 %v691_v47, 16  ;;  %v750_v56 = vshll.u32 %v691_v47, 16  ;;  %v735_v58 = vrot.slane %v733_v48, 4  ;;  %v738_v59 = vrot.slane %v736_v49, 5  ;;  %v693_v60 = vld [vmem:[%s6446_s24 + $0x20] sm:$0xf] }
  0x19   : > { %v711_v37 = vor.u32 %v710_v30, %v707_v29  ;;  %v725_v38 = vor.u32 %v724_v32, %v721_v31  ;;  %v690_v61 = vld [vmem:[%s6446_s24 + $0x14] sm:$0x1]  ;;  %v692_v62 = vld [vmem:[%s6446_s24 + $0x1c] sm:$0x1]  ;;  %v695_v63 = vld [vmem:[%s6446_s24 + $0x28] sm:$0xf] }
  0x1a   : > { %v749_v1 = vrot.slane %v747_v55, 4  ;;  %v752_v2 = vrot.slane %v750_v56, 5  ;;  %v761_v3 = vshrl.u32 %v693_v60, 16  ;;  %v764_v4 = vshll.u32 %v693_v60, 16  ;;  %v6188_v28 = vld [vmem:[%s7436_s1 + $0xb0] sm:$0xff]   ;;  %v6192_v60 = vld [vmem:[%s7436_s1 + $0xc8] sm:$0xff]  }
  0x1b   : > { %5560 = vmatpush3.bf16.msra.mxu0 %v6164_v6  ;;  %v712_v44 = vrot.slane %v711_v37, 4  ;;  %v726_v45 = vrot.slane %v725_v38, 4  ;;  %v775_v5 = vshrl.u32 %v695_v63, 16  ;;  %v778_v6 = vshll.u32 %v695_v63, 16  ;;  %v698_v35 = vld [vmem:[%s6446_s24 + $0x34] sm:$0x1] }
  0x1c   : > { %5561 = vmatprep.subr.bf16.mxu0 %v6165_v7  ;;  %v700_v37 = vld [vmem:[%s6446_s24 + $0x3c] sm:$0x1] }
  0x1d   : > { %v717_v51 = vsel %vm6506_vm2, %v712_v44, %v716_v42  ;;  %v731_v52 = vsel %vm6506_vm2, %v726_v45, %v730_v43  ;;  %v780_v19 = vrot.slane %v778_v6, 5  ;;  %v798_v45 = vshll.u32 %v698_v35, 16  ;;  %v6198_v6 = vld [vmem:[%s7436_s1 + $0xf8] sm:$0xff]   ;;  %v6212_v35 = vld [vmem:[%s7436_s1 + $0x140] sm:$0xff]  }
  0x1e   : > { %v4772_v57 = vcombine.low %v717_v51, %v731_v52  ;;  %v6191_v51 = vld [vmem:[%s7436_s1 + $0xc0] sm:$0xff]  }
  0x1f   : > { %5562 = vmatpush3.bf16.msra.mxu0 %v6165_v7  ;;  %v6186_v7 = vld [vmem:[%s7436_s1 + $0xa8] sm:$0xff]   ;;  %v800_v55 = vrot.slane %v798_v45, 5 }
  0x20   : > { %5563 = vmatprep.subr.bf16.mxu0 %v6166_v8 }
  0x23   : > { %5564 = vmatpush3.bf16.msra.mxu0 %v6166_v8  ;;  %v742_v8 = vshll.u32 %v690_v61, 16  ;;  %v6193_v61 = vld [vmem:[%s7436_s1 + $0xd0] sm:$0xff]  }
  0x24   : > { %5573 = vmatprep.subr.bf16.mxu0 %v6168_v9 }
  0x25   : > { %v744_v26 = vrot.slane %v742_v8, 5  ;;  %v6201_v8 = vld [vmem:[%s6446_s24 + $0xa0] ss:$8 sps:$4 sm:$0xff]  }
  0x26   : > { %5566 = vmatmul.mubr.bf16.vlgmr.msra.gmra.mrb[0].mxu0 %v6169_v10  ;;  %v694_v10 = vld [vmem:[%s6446_s24 + $0x24] sm:$0x1] }
  0x27   : > { %5574 = vmatpush3.bf16.msra.mxu0 %v6168_v9  ;;  %5569 = vmatprep.mubr.bf16.mxu0 %v6175_v11  ;;  %v756_v9 = vshll.u32 %v692_v62, 16  ;;  %v696_v11 = vld [vmem:[%s6446_s24 + $0x2c] sm:$0x1]  ;;  %v770_v20 = vshll.u32 %v694_v10, 16 }
  0x28   : > { %5575 = vmatprep.subr.bf16.mxu0 %v6170_v12  ;;  %v784_v21 = vshll.u32 %v696_v11, 16  ;;  %v6202_v10 = vld [vmem:[%s7436_s1 + $0x108] sm:$0xff]   ;;  %v6203_v11 = vld [vmem:[%s7436_s1 + $0x110] sm:$0xff]  }
  0x2a   : > { %v786_v34 = vrot.slane %v784_v21, 5  ;;  %v6208_v21 = vld [vmem:[%s7436_s1 + $0x130] sm:$0xff]  }
  0x2b   : > { %5576 = vmatpush3.bf16.msra.mxu0 %v6170_v12  ;;  %v739_v12 = vor.u32 %v738_v59, %v735_v58 }
  0x2c   : > { %5577 = vmatprep.subr.bf16.mxu0 %v6171_v13 }
  0x2d   : > { %v740_v29 = vrot.slane %v739_v12, 4  ;;  %v6209_v12 = vld [vmem:[%s6446_s24 + $0xc0] ss:$8 sps:$4 sm:$0xff]  }
  0x2e   : > { %5570 = vmatmul.mubr.bf16.gmra.mrb[4].mxu0 %v6177_v14  ;;  %v697_v14 = vld [vmem:[%s6446_s24 + $0x30] sm:$0xf] }
  0x2f   : > { %5578 = vmatpush3.bf16.msra.mxu0 %v6171_v13  ;;  %5589 = vmatprep.mubr.bf16.mxu0 %v6179_v15  ;;  %v753_v13 = vor.u32 %v752_v2, %v749_v1  ;;  %v699_v15 = vld [vmem:[%s6446_s24 + $0x38] sm:$0xf]  ;;  %v789_v22 = vshrl.u32 %v697_v14, 16  ;;  %v745_v44 = vsel %vm6506_vm2, %v740_v29, %v744_v26 }
  0x30   : > { %5579 = vmatprep.subr.bf16.mxu0 %v6172_v16  ;;  %v803_v24 = vshrl.u32 %v699_v15, 16  ;;  %v806_v25 = vshll.u32 %v699_v15, 16  ;;  %v6199_v2 = vld [vmem:[%s6446_s24 + $0x90] ss:$8 sps:$4 sm:$0xff]   ;;  %v6205_v15 = vld [vmem:[%s7436_s1 + $0x120] sm:$0xff]  }
  0x31   : > { %v754_v30 = vrot.slane %v753_v13, 4  ;;  %v791_v38 = vrot.slane %v789_v22, 4  ;;  %v6204_v13 = vld [vmem:[%s7436_s1 + $0x118] sm:$0xff]  }
  0x32   : > { %v808_v41 = vrot.slane %v806_v25, 5  ;;  %v4859_v25 = vld [vmem:[%s6446_s24 + $0x9c] sm:$0x1] }
  0x33   : > { %5580 = vmatpush3.bf16.msra.mxu0 %v6172_v16  ;;  %v763_v16 = vrot.slane %v761_v3, 4  ;;  %v6195_v3 = vld [vmem:[%s7436_s1 + $0xe0] sm:$0xff]  }
  0x34   : > { %5581 = vmatprep.subr.bf16.mxu0 %v6173_v17 }
  0x37   : > { %5582 = vmatpush3.bf16.msra.mxu0 %v6173_v17  ;;  %v766_v17 = vrot.slane %v764_v4, 5  ;;  %v6196_v4 = vld [vmem:[%s7436_s1 + $0xe8] sm:$0xff]  }
  0x38   : > { %5583 = vmatprep.subr.bf16.mxu0 %v6174_v18 }
  0x39   : > { %v767_v31 = vor.u32 %v766_v17, %v763_v16  ;;  %v4856_v16 = vld [vmem:[%s6446_s24 + $0x90] sm:$0xf]  ;;  %v6206_v17 = vld [vmem:[%s7436_s1 + $0x128] sm:$0xff]  }
  0x3b   : > { %5584 = vmatpush3.bf16.msra.mxu0 %v6174_v18  ;;  %v777_v18 = vrot.slane %v775_v5, 4  ;;  %v768_v42 = vrot.slane %v767_v31, 4  ;;  %v6197_v5 = vld [vmem:[%s7436_s1 + $0xf0] sm:$0xff]  }
  0x3c   : > { %5585 = vmatprep.subr.bf16.mxu0 %v6176_v23 }
  0x3d   : > { %v781_v32 = vor.u32 %v780_v19, %v777_v18  ;;  %v4858_v18 = vld [vmem:[%s6446_s24 + $0x98] sm:$0xf]  ;;  %v1329_v19 = vshrl.u32 %v4856_v16, 16 }
  0x3e   : > { %v1343_v22 = vshrl.u32 %v4858_v18, 16 }
  0x3f   : > { %5586 = vmatpush3.bf16.msra.mxu0 %v6176_v23  ;;  %v792_v23 = vshll.u32 %v697_v14, 16  ;;  %v782_v43 = vrot.slane %v781_v32, 4  ;;  %v6211_v14 = vld [vmem:[%s6446_s24 + $0xd8] ss:$8 sps:$4 sm:$0xff]   ;;  %v1331_v26 = vrot.slane %v1329_v19, 4  ;;  %v1352_v32 = vshll.u32 %v4859_v25, 16 }
  0x40   : > { %5587 = vmatprep.subr.bf16.mxu0 %v6178_v27 }
  0x43   : > { %5588 = vmatpush3.bf16.msra.mxu0 %v6178_v27  ;;  %v758_v27 = vrot.slane %v756_v9, 5  ;;  %v6207_v9 = vld [vmem:[%s6446_s24 + $0xb0] ss:$8 sps:$4 sm:$0xff]  }
  0x44   : > { %5597 = vmatprep.subr.bf16.mxu0 %v6180_v33 }
  0x45   : > { %v759_v47 = vsel %vm6506_vm2, %v754_v30, %v758_v27  ;;  %v6210_v30 = vld [vmem:[%s7436_s1 + $0x138] sm:$0xff]  }
  0x46   : > { %5590 = vmatmul.mubr.bf16.vlgmr.msra.gmra.mrb[0].mxu0 %v6181_v36  ;;  %v6190_v36 = vld [vmem:[%s7436_s1 + $0xb8] sm:$0xff]  }
  0x47   : > { %5598 = vmatpush3.bf16.msra.mxu0 %v6180_v33  ;;  %5593 = vmatprep.mubr.bf16.mxu0 %v6187_v39  ;;  %v772_v33 = vrot.slane %v770_v20, 5  ;;  %v794_v39 = vrot.slane %v792_v23, 5  ;;  %v1332_v20 = vshll.u32 %v4856_v16, 16  ;;  %v1346_v23 = vshll.u32 %v4858_v18, 16 }
  0x48   : > { %5599 = vmatprep.subr.bf16.mxu0 %v6182_v40 }
  0x49   : > { %v795_v48 = vor.u32 %v794_v39, %v791_v38  ;;  %v773_v52 = vsel %vm6506_vm2, %v768_v42, %v772_v33  ;;  %v1334_v27 = vrot.slane %v1332_v20, 5  ;;  %v1348_v29 = vrot.slane %v1346_v23, 5  ;;  %v4860_v33 = vld [vmem:[%s6446_s24 + $0xa0] sm:$0xf]  ;;  %v4864_v38 = vld [vmem:[%s6446_s24 + $0xb0] sm:$0xf] }
  0x4a   : > { %v4866_v39 = vld [vmem:[%s6446_s24 + $0xb8] sm:$0xf]  ;;  %v1354_v42 = vrot.slane %v1352_v32, 5  ;;  %v1360_v45 = vshll.u32 %v4860_v33, 16  ;;  %v4871_v20 = vld [vmem:[%s6446_s24 + $0xcc] sm:$0x1] }
  0x4b   : > { %5600 = vmatpush3.bf16.msra.mxu0 %v6182_v40  ;;  %v805_v40 = vrot.slane %v803_v24, 4  ;;  %v4857_v24 = vld [vmem:[%s6446_s24 + $0x94] sm:$0x1] }
  0x4c   : > { %5601 = vmatprep.subr.bf16.mxu0 %v6183_v50  ;;  %v1338_v31 = vshll.u32 %v4857_v24, 16 }
  0x4d   : > { %v809_v49 = vor.u32 %v808_v41, %v805_v40  ;;  %v6213_v40 = vld [vmem:[%s6446_s24 + $0xe8] ss:$8 sps:$4 sm:$0xff]  }
  0x4e   : > { %5594 = vmatmul.mubr.bf16.gmra.mrb[4].mxu0 %v6189_v53  ;;  %v787_v53 = vsel %vm6506_vm2, %v782_v43, %v786_v34  ;;  %v4862_v34 = vld [vmem:[%s6446_s24 + $0xa8] sm:$0xf]  ;;  %v1340_v41 = vrot.slane %v1338_v31, 5  ;;  %v4868_v43 = vld [vmem:[%s6446_s24 + $0xc0] sm:$0xf] }
  0x4f   : > { %5602 = vmatpush3.bf16.msra.mxu0 %v6183_v50  ;;  %5613 = vmatprep.mubr.bf16.mxu0 %v4772_v57  ;;  %v812_v50 = vshll.u32 %v700_v37, 16  ;;  %v4774_v56 = vcombine.low %v773_v52, %v787_v53  ;;  %v796_v57 = vrot.slane %v795_v48, 4  ;;  %v810_v58 = vrot.slane %v809_v49, 4  ;;  %v4870_v49 = vld [vmem:[%s6446_s24 + $0xc8] sm:$0xf] }
  0x50   : > { %5603 = vmatprep.subr.bf16.mxu0 %v6184_v54  ;;  %v1374_v48 = vshll.u32 %v4862_v34, 16  ;;  %v1385_v52 = vshrl.u32 %v4864_v38, 16  ;;  %v1388_v53 = vshll.u32 %v4864_v38, 16 }
  0x51   : > { %v814_v59 = vrot.slane %v812_v50, 5  ;;  %v801_v62 = vsel %vm6506_vm2, %v796_v57, %v800_v55  ;;  %v6214_v50 = vld [vmem:[%s7436_s1 + $0x148] sm:$0xff]   ;;  %v1402_v55 = vshll.u32 %v4866_v39, 16 }
  0x53   : > { %5604 = vmatpush3.bf16.msra.mxu0 %v6184_v54  ;;  %v4773_v54 = vcombine.low %v745_v44, %v759_v47  ;;  %v815_v63 = vsel %vm6506_vm2, %v810_v58, %v814_v59  ;;  %v1357_v44 = vshrl.u32 %v4860_v33, 16  ;;  %v1371_v47 = vshrl.u32 %v4862_v34, 16 }
  0x54   : > { %5605 = vmatprep.subr.bf16.mxu0 %v6185_v0  ;;  %v4775_v1 = vcombine.low %v801_v62, %v815_v63  ;;  %v1413_v58 = vshrl.u32 %v4868_v43, 16  ;;  %v1416_v59 = vshll.u32 %v4868_v43, 16  ;;  %v1427_v62 = vshrl.u32 %v4870_v49, 16 }
  0x55   : > { %v1430_v63 = vshll.u32 %v4870_v49, 16  ;;  %v1436_v33 = vshll.u32 %v4871_v20, 16  ;;  %v6236_v20 = vld [vmem:[%s7436_s1 + $0x1d8] sm:$0xff]  }
  0x56   : > { %v1429_v16 = vrot.slane %v1427_v62, 4  ;;  %v6261_v62 = vld [vmem:[%s7442_s7 + $0x30] sm:$0xff]  }
  0x57   : > { %5606 = vmatpush3.bf16.msra.mxu0 %v6185_v0  ;;  %v6194_v0 = vld [vmem:[%s7436_s1 + $0xd8] sm:$0xff]   ;;  %v1438_v49 = vrot.slane %v1436_v33, 5 }
  0x58   : > { %5607 = vmatprep.subr.bf16.mxu0 %v6186_v7 }
  0x5b   : > { %5608 = vmatpush3.bf16.msra.mxu0 %v6186_v7  ;;  %v6200_v7 = vld [vmem:[%s7436_s1 + $0x100] sm:$0xff]  }
  0x5c   : > { %5609 = vmatprep.subr.bf16.mxu0 %v6188_v28 }
  0x5f   : > { %5610 = vmatpush3.bf16.msra.mxu0 %v6188_v28  ;;  %v1345_v28 = vrot.slane %v1343_v22, 4 }
  0x60   : > { %5611 = vmatprep.subr.bf16.mxu0 %v6190_v36 }
  0x61   : > { %v1349_v37 = vor.u32 %v1348_v29, %v1345_v28 }
  0x63   : > { %5612 = vmatpush3.bf16.msra.mxu0 %v6190_v36  ;;  %v1335_v36 = vor.u32 %v1334_v27, %v1331_v26  ;;  %v1350_v57 = vrot.slane %v1349_v37, 4 }
  0x64   : > { %5621 = vmatprep.subr.bf16.mxu0 %v6191_v51 }
  0x66   : > { %5614 = vmatmul.mubr.bf16.vlgmr.msra.gmra.mrb[0].mxu0 %v4773_v54  ;;  %v1399_v54 = vshrl.u32 %v4866_v39, 16  ;;  %v6255_v39 = vld [vmem:[%s7442_s7] sm:$0xff]  }
  0x67   : > { %5622 = vmatpush3.bf16.msra.mxu0 %v6191_v51  ;;  %5617 = vmatprep.mubr.bf16.mxu0 %v4774_v56  ;;  %v6219_v51 = vld [vmem:[%s6446_s24 + $0xf8] ss:$8 sps:$4 sm:$0xff]   ;;  %v1336_v56 = vrot.slane %v1335_v36, 4 }
  0x68   : > { %5623 = vmatprep.subr.bf16.mxu0 %v6192_v60  ;;  %5765 = vmatprep.subr.bf16.mxu1 %v6255_v39 }
  0x69   : > { %5766 = vmatpush3.bf16.msra.mxu1 %v6255_v39 }
  0x6b   : > { %5624 = vmatpush3.bf16.msra.mxu0 %v6192_v60  ;;  %v4861_v60 = vld [vmem:[%s6446_s24 + $0xa4] sm:$0x1] }
  0x6c   : > { %5625 = vmatprep.subr.bf16.mxu0 %v6193_v61  ;;  %v1366_v18 = vshll.u32 %v4861_v60, 16 }
  0x6e   : > { %5618 = vmatmul.mubr.bf16.gmra.mrb[4].mxu0 %v4775_v1  ;;  %v1362_v1 = vrot.slane %v1360_v45, 5  ;;  %v1368_v34 = vrot.slane %v1366_v18, 5  ;;  %v6241_v18 = vld [vmem:[%s6446_s24 + $0x38] ss:$8 sps:$4 sm:$0xff]  }
  0x6f   : > { %5626 = vmatpush3.bf16.msra.mxu0 %v6193_v61  ;;  %5637 = vmatprep.mubr.bf16.mxu0 %v6199_v2  ;;  %v4863_v61 = vld [vmem:[%s6446_s24 + $0xac] sm:$0x1]  ;;  %v1373_v2 = vrot.slane %v1371_v47, 4 }
  0x70   : > { %5627 = vmatprep.subr.bf16.mxu0 %v6194_v0  ;;  %v1380_v19 = vshll.u32 %v4863_v61, 16 }
  0x72   : > { %v1382_v37 = vrot.slane %v1380_v19, 5  ;;  %v6243_v19 = vld [vmem:[%s6446_s24 + $0x50] ss:$8 sps:$4 sm:$0xff]  }
  0x73   : > { %5628 = vmatpush3.bf16.msra.mxu0 %v6194_v0  ;;  %v1359_v0 = vrot.slane %v1357_v44, 4 }
  0x74   : > { %5629 = vmatprep.subr.bf16.mxu0 %v6195_v3 }
  0x75   : > { %v1363_v23 = vor.u32 %v1362_v1, %v1359_v0  ;;  %v6224_v0 = vld [vmem:[%s7436_s1 + $0x188] sm:$0xff]  }
  0x77   : > { %5630 = vmatpush3.bf16.msra.mxu0 %v6195_v3  ;;  %v1376_v3 = vrot.slane %v1374_v48, 5 }
  0x78   : > { %5631 = vmatprep.subr.bf16.mxu0 %v6196_v4 }
  0x79   : > { %v1377_v24 = vor.u32 %v1376_v3, %v1373_v2  ;;  %v6262_v2 = vld [vmem:[%s7442_s7 + $0x38] sm:$0xff]  }
  0x7b   : > { %5632 = vmatpush3.bf16.msra.mxu0 %v6196_v4  ;;  %v4865_v4 = vld [vmem:[%s6446_s24 + $0xb4] sm:$0x1]  ;;  %v1378_v36 = vrot.slane %v1377_v24, 4  ;;  %v4974_v24 = vld [vmem:[%s6446_s24 + $0x10] sm:$0xf] }
  0x7c   : > { %5633 = vmatprep.subr.bf16.mxu0 %v6197_v5  ;;  %v1394_v25 = vshll.u32 %v4865_v4, 16 }
  0x7e   : > { %v1396_v38 = vrot.slane %v1394_v25, 5  ;;  %v6240_v25 = vld [vmem:[%s7436_s1 + $0x1f0] sm:$0xff]  }
  0x7f   : > { %5634 = vmatpush3.bf16.msra.mxu0 %v6197_v5  ;;  %v6215_v5 = vld [vmem:[%s7436_s1 + $0x150] sm:$0xff]  }
  0x80   : > { %5635 = vmatprep.subr.bf16.mxu0 %v6198_v6 }
  0x83   : > { %5636 = vmatpush3.bf16.msra.mxu0 %v6198_v6  ;;  %v4867_v6 = vld [vmem:[%s6446_s24 + $0xbc] sm:$0x1] }
  0x84   : > { %5645 = vmatprep.subr.bf16.mxu0 %v6200_v7  ;;  %v1408_v28 = vshll.u32 %v4867_v6, 16 }
  0x86   : > { %5638 = vmatmul.mubr.bf16.vlgmr.msra.gmra.mrb[0].mxu0 %v6201_v8  ;;  %v1390_v8 = vrot.slane %v1388_v53, 5  ;;  %v1410_v44 = vrot.slane %v1408_v28, 5  ;;  %v6220_v53 = vld [vmem:[%s7436_s1 + $0x170] sm:$0xff]   ;;  %v1967_v28 = vshrl.u32 %v4974_v24, 16 }
  0x87   : > { %5646 = vmatpush3.bf16.msra.mxu0 %v6200_v7  ;;  %5641 = vmatprep.mubr.bf16.mxu0 %v6207_v9  ;;  %v1387_v7 = vrot.slane %v1385_v52, 4  ;;  %v1401_v9 = vrot.slane %v1399_v54, 4  ;;  %v6258_v52 = vld [vmem:[%s7442_s7 + $0x18] sm:$0xff]   ;;  %v6259_v54 = vld [vmem:[%s7442_s7 + $0x20] sm:$0xff]  }
  0x88   : > { %5647 = vmatprep.subr.bf16.mxu0 %v6202_v10  ;;  %v1969_v33 = vrot.slane %v1967_v28, 4  ;;  %v6253_v28 = vld [vmem:[%s7436_s1 + $0x230] sm:$0xff]  }
  0x89   : > { %v1391_v26 = vor.u32 %v1390_v8, %v1387_v7  ;;  %v6231_v7 = vld [vmem:[%s6446_s24 + $0x8] ss:$8 sps:$4 sm:$0xff]   ;;  %v6226_v8 = vld [vmem:[%s7436_s1 + $0x198] sm:$0xff]  }
  0x8b   : > { %5648 = vmatpush3.bf16.msra.mxu0 %v6202_v10  ;;  %v1404_v10 = vrot.slane %v1402_v55, 5  ;;  %v6222_v55 = vld [vmem:[%s7436_s1 + $0x178] sm:$0xff]  }
  0x8c   : > { %5649 = vmatprep.subr.bf16.mxu0 %v6203_v11 }
  0x8d   : > { %v1405_v27 = vor.u32 %v1404_v10, %v1401_v9  ;;  %v6227_v9 = vld [vmem:[%s7436_s1 + $0x1a0] sm:$0xff]   ;;  %v6228_v10 = vld [vmem:[%s7436_s1 + $0x1a8] sm:$0xff]  }
  0x8e   : > { %5642 = vmatmul.mubr.bf16.gmra.mrb[4].mxu0 %v6209_v12  ;;  %v1355_v12 = vsel %vm6506_vm2, %v1350_v57, %v1354_v42  ;;  %v1392_v42 = vrot.slane %v1391_v26, 4  ;;  %v6223_v57 = vld [vmem:[%s7436_s1 + $0x180] sm:$0xff]  }
  0x8f   : > { %5650 = vmatpush3.bf16.msra.mxu0 %v6203_v11  ;;  %5661 = vmatprep.mubr.bf16.mxu0 %v6211_v14  ;;  %v1341_v11 = vsel %vm6506_vm2, %v1336_v56, %v1340_v41  ;;  %v1415_v14 = vrot.slane %v1413_v58, 4  ;;  %v6217_v41 = vld [vmem:[%s7436_s1 + $0x160] sm:$0xff]   ;;  %v1406_v43 = vrot.slane %v1405_v27, 4  ;;  %v6260_v56 = vld [vmem:[%s7442_s7 + $0x28] sm:$0xff]  }
  0x90   : > { %5651 = vmatprep.subr.bf16.mxu0 %v6204_v13  ;;  %v4888_v22 = vcombine.low %v1341_v11, %v1355_v12  ;;  %v1397_v60 = vsel %vm6506_vm2, %v1392_v42, %v1396_v38  ;;  %v6229_v11 = vld [vmem:[%s7436_s1 + $0x1b0] sm:$0xff]   ;;  %v6230_v12 = vld [vmem:[%s7436_s1 + $0x1b8] sm:$0xff]   ;;  %v6245_v42 = vld [vmem:[%s6446_s24 + $0x60] ss:$8 sps:$4 sm:$0xff]  }
  0x91   : > { %v1411_v61 = vsel %vm6506_vm2, %v1406_v43, %v1410_v44  ;;  %v6251_v43 = vld [vmem:[%s6446_s24 + $0x70] ss:$8 sps:$4 sm:$0xff]   ;;  %v6246_v44 = vld [vmem:[%s7436_s1 + $0x208] sm:$0xff]  }
  0x92   : > { %v4890_v1 = vcombine.low %v1397_v60, %v1411_v61 }
  0x93   : > { %5652 = vmatpush3.bf16.msra.mxu0 %v6204_v13  ;;  %v4869_v13 = vld [vmem:[%s6446_s24 + $0xc4] sm:$0x1] }
  0x94   : > { %5653 = vmatprep.subr.bf16.mxu0 %v6205_v15  ;;  %v1422_v29 = vshll.u32 %v4869_v13, 16  ;;  %v6232_v13 = vld [vmem:[%s7436_s1 + $0x1c0] sm:$0xff]  }
  0x96   : > { %v1424_v45 = vrot.slane %v1422_v29, 5  ;;  %v1970_v29 = vshll.u32 %v4974_v24, 16 }
  0x97   : > { %5654 = vmatpush3.bf16.msra.mxu0 %v6205_v15  ;;  %v1418_v15 = vrot.slane %v1416_v59, 5  ;;  %v1383_v59 = vsel %vm6506_vm2, %v1378_v36, %v1382_v37  ;;  %v4975_v36 = vld [vmem:[%s6446_s24 + $0x14] sm:$0x1]  ;;  %v6244_v37 = vld [vmem:[%s7436_s1 + $0x200] sm:$0xff]  }
  0x98   : > { %5655 = vmatprep.subr.bf16.mxu0 %v6206_v17 }
  0x99   : > { %v1419_v31 = vor.u32 %v1418_v15, %v1415_v14  ;;  %v6233_v14 = vld [vmem:[%s6446_s24 + $0x18] ss:$8 sps:$4 sm:$0xff]   ;;  %v6239_v15 = vld [vmem:[%s6446_s24 + $0x28] ss:$8 sps:$4 sm:$0xff]  }
  0x9b   : > { %5656 = vmatpush3.bf16.msra.mxu0 %v6206_v17  ;;  %v1432_v17 = vrot.slane %v1430_v63, 5  ;;  %v1420_v47 = vrot.slane %v1419_v31, 4 }
  0x9c   : > { %5657 = vmatprep.subr.bf16.mxu0 %v6208_v21 }
  0x9d   : > { %v1433_v32 = vor.u32 %v1432_v17, %v1429_v16  ;;  %v1425_v3 = vsel %vm6506_vm2, %v1420_v47, %v1424_v45  ;;  %v6234_v16 = vld [vmem:[%s7436_s1 + $0x1c8] sm:$0xff]   ;;  %v6235_v17 = vld [vmem:[%s7436_s1 + $0x1d0] sm:$0xff]  }
  0x9f   : > { %5658 = vmatpush3.bf16.msra.mxu0 %v6208_v21  ;;  %v6221_v21 = vld [vmem:[%s6446_s24 + $0x108] ss:$8 sps:$4 sm:$0xff]   ;;  %v1434_v48 = vrot.slane %v1433_v32, 4 }
  0xa0   : > { %5659 = vmatprep.subr.bf16.mxu0 %v6210_v30 }
  0xa1   : > { %v1439_v4 = vsel %vm6506_vm2, %v1434_v48, %v1438_v49 }
  0xa2   : > { %v4891_v6 = vcombine.low %v1425_v3, %v1439_v4 }
  0xa3   : > { %5660 = vmatpush3.bf16.msra.mxu0 %v6210_v30  ;;  %v6216_v30 = vld [vmem:[%s7436_s1 + $0x158] sm:$0xff]  }
  0xa4   : > { %5669 = vmatprep.subr.bf16.mxu0 %v6212_v35 }
  0xa6   : > { %5662 = vmatmul.mubr.bf16.vlgmr.msra.gmra.mrb[0].mxu0 %v6213_v40  ;;  %v6256_v40 = vld [vmem:[%s7442_s7 + $0x8] sm:$0xff]  }
  0xa7   : > { %5670 = vmatpush3.bf16.msra.mxu0 %v6212_v35  ;;  %5665 = vmatprep.mubr.bf16.mxu0 %v6219_v51  ;;  %v1364_v35 = vrot.slane %v1363_v23, 4  ;;  %v6218_v51 = vld [vmem:[%s7436_s1 + $0x168] sm:$0xff]  }
  0xa8   : > { %5671 = vmatprep.subr.bf16.mxu0 %v6214_v50  ;;  %5767 = vmatprep.subr.bf16.mxu1 %v6256_v40  ;;  %v4972_v23 = vld [vmem:[%s6446_s24 + $0x8] sm:$0xf] }
  0xa9   : > { %5768 = vmatpush3.bf16.msra.mxu1 %v6256_v40  ;;  %v1369_v58 = vsel %vm6506_vm2, %v1364_v35, %v1368_v34  ;;  %v1953_v26 = vshrl.u32 %v4972_v23, 16  ;;  %v1956_v27 = vshll.u32 %v4972_v23, 16  ;;  %v1972_v34 = vrot.slane %v1970_v29, 5  ;;  %v4973_v35 = vld [vmem:[%s6446_s24 + $0xc] sm:$0x1] }
  0xaa   : > { %v4889_v63 = vcombine.low %v1369_v58, %v1383_v59  ;;  %v1962_v39 = vshll.u32 %v4973_v35, 16  ;;  %v4980_v58 = vld [vmem:[%s6446_s24 + $0x28] sm:$0xf]  ;;  %v4982_v59 = vld [vmem:[%s6446_s24 + $0x30] sm:$0xf] }
  0xab   : > { %5672 = vmatpush3.bf16.msra.mxu0 %v6214_v50  ;;  %v6257_v50 = vld [vmem:[%s7442_s7 + $0x10] sm:$0xff]   ;;  %v1955_v31 = vrot.slane %v1953_v26, 4  ;;  %v1958_v32 = vrot.slane %v1956_v27, 5  ;;  %v1973_v40 = vor.u32 %v1972_v34, %v1969_v33  ;;  %v2023_v3 = vshrl.u32 %v4982_v59, 16  ;;  %v6254_v33 = vld [vmem:[%s7436_s1 + $0x238] sm:$0xff]  }
  0xac   : > { %5673 = vmatprep.subr.bf16.mxu0 %v6215_v5  ;;  %5769 = vmatprep.subr.bf16.mxu1 %v6257_v50  ;;  %v1964_v47 = vrot.slane %v1962_v39, 5  ;;  %v2026_v4 = vshll.u32 %v4982_v59, 16 }
  0xad   : > { %5770 = vmatpush3.bf16.msra.mxu1 %v6257_v50  ;;  %v1959_v38 = vor.u32 %v1958_v32, %v1955_v31  ;;  %v1974_v48 = vrot.slane %v1973_v40, 4  ;;  %v6247_v50 = vld [vmem:[%s7436_s1 + $0x210] sm:$0xff]  }
  0xae   : > { %5666 = vmatmul.mubr.bf16.gmra.mrb[4].mxu0 %v6221_v21  ;;  %5771 = vmatprep.subr.bf16.mxu1 %v6258_v52  ;;  %v6237_v21 = vld [vmem:[%s7436_s1 + $0x1e0] sm:$0xff]  }
  0xaf   : > { %5674 = vmatpush3.bf16.msra.mxu0 %v6215_v5  ;;  %5685 = vmatprep.mubr.bf16.mxu0 %v4888_v22  ;;  %v6225_v5 = vld [vmem:[%s7436_s1 + $0x190] sm:$0xff]   ;;  %v6238_v22 = vld [vmem:[%s7436_s1 + $0x1e8] sm:$0xff]   ;;  %v1960_v45 = vrot.slane %v1959_v38, 4  ;;  %v4985_v38 = vld [vmem:[%s6446_s24 + $0x3c] sm:$0x1] }
  0xb0   : > { %5675 = vmatprep.subr.bf16.mxu0 %v6216_v30 }
  0xb1   : > { %5772 = vmatpush3.bf16.msra.mxu1 %v6258_v52 }
  0xb2   : > { %5773 = vmatprep.subr.bf16.mxu1 %v6259_v54 }
  0xb3   : > { %5676 = vmatpush3.bf16.msra.mxu0 %v6216_v30  ;;  %v6242_v30 = vld [vmem:[%s7436_s1 + $0x1f8] sm:$0xff]  }
  0xb4   : > { %5677 = vmatprep.subr.bf16.mxu0 %v6217_v41 }
  0xb5   : > { %5774 = vmatpush3.bf16.msra.mxu1 %v6259_v54 }
  0xb6   : > { %5775 = vmatprep.subr.bf16.mxu1 %v6260_v56 }
  0xb7   : > { %5678 = vmatpush3.bf16.msra.mxu0 %v6217_v41  ;;  %v1976_v41 = vshll.u32 %v4975_v36, 16 }
  0xb8   : > { %5679 = vmatprep.subr.bf16.mxu0 %v6218_v51 }
  0xb9   : > { %5776 = vmatpush3.bf16.msra.mxu1 %v6260_v56  ;;  %v1978_v49 = vrot.slane %v1976_v41, 5  ;;  %v4978_v56 = vld [vmem:[%s6446_s24 + $0x20] sm:$0xf] }
  0xba   : > { %5777 = vmatprep.subr.bf16.mxu1 %v6261_v62 }
  0xbb   : > { %5680 = vmatpush3.bf16.msra.mxu0 %v6218_v51  ;;  %v1965_v51 = vsel %vm6506_vm2, %v1960_v45, %v1964_v47  ;;  %v1979_v52 = vsel %vm6506_vm2, %v1974_v48, %v1978_v49  ;;  %v4987_v48 = vld [vmem:[%s6446_s24 + $0x44] sm:$0x1] }
  0xbc   : > { %5681 = vmatprep.subr.bf16.mxu0 %v6220_v53  ;;  %v5004_v54 = vcombine.low %v1965_v51, %v1979_v52 }
  0xbd   : > { %5778 = vmatpush3.bf16.msra.mxu1 %v6261_v62  ;;  %v1995_v62 = vshrl.u32 %v4978_v56, 16 }
  0xbe   : > { %5779 = vmatprep.subr.bf16.mxu1 %v6262_v2 }
  0xbf   : > { %5682 = vmatpush3.bf16.msra.mxu0 %v6220_v53  ;;  %v6252_v53 = vld [vmem:[%s6446_s24 + $0x80] ss:$8 sps:$4 sm:$0xff]  }
  0xc0   : > { %5683 = vmatprep.subr.bf16.mxu0 %v6222_v55 }
  0xc1   : > { %5780 = vmatpush3.bf16.msra.mxu1 %v6262_v2  ;;  %v2012_v2 = vshll.u32 %v4980_v58, 16 }
  0xc3   : > { %5684 = vmatpush3.bf16.msra.mxu0 %v6222_v55  ;;  %v4976_v55 = vld [vmem:[%s6446_s24 + $0x18] sm:$0xf] }
  0xc4   : > { %5693 = vmatprep.subr.bf16.mxu0 %v6223_v57  ;;  %v1981_v60 = vshrl.u32 %v4976_v55, 16  ;;  %v1984_v61 = vshll.u32 %v4976_v55, 16 }
  0xc6   : > { %5686 = vmatmul.mubr.bf16.vlgmr.msra.gmra.mrb[0].mxu0 %v4889_v63  ;;  %v1998_v63 = vshll.u32 %v4978_v56, 16 }
  0xc7   : > { %5694 = vmatpush3.bf16.msra.mxu0 %v6223_v57  ;;  %5689 = vmatprep.mubr.bf16.mxu0 %v4890_v1  ;;  %v6248_v57 = vld [vmem:[%s7436_s1 + $0x218] sm:$0xff]   ;;  %v2009_v1 = vshrl.u32 %v4980_v58, 16 }
  0xc8   : > { %5695 = vmatprep.subr.bf16.mxu0 %v6224_v0 }
  0xcb   : > { %5696 = vmatpush3.bf16.msra.mxu0 %v6224_v0  ;;  %v6249_v0 = vld [vmem:[%s7436_s1 + $0x220] sm:$0xff]  }
  0xcc   : > { %5697 = vmatprep.subr.bf16.mxu0 %v6225_v5 }
  0xce   : > { %5690 = vmatmul.mubr.bf16.gmra.mrb[4].mxu0 %v4891_v6  ;;  %v1983_v6 = vrot.slane %v1981_v60, 4 }
  0xcf   : > { %5698 = vmatpush3.bf16.msra.mxu0 %v6225_v5  ;;  %5709 = vmatprep.mubr.bf16.mxu0 %v6231_v7  ;;  %v6250_v5 = vld [vmem:[%s7436_s1 + $0x228] sm:$0xff]   ;;  %v1986_v7 = vrot.slane %v1984_v61, 5 }
  0xd0   : > { %5699 = vmatprep.subr.bf16.mxu0 %v6226_v8 }
  0xd3   : > { %5700 = vmatpush3.bf16.msra.mxu0 %v6226_v8  ;;  %v1997_v8 = vrot.slane %v1995_v62, 4 }
  0xd4   : > { %5701 = vmatprep.subr.bf16.mxu0 %v6227_v9 }
  0xd7   : > { %5702 = vmatpush3.bf16.msra.mxu0 %v6227_v9  ;;  %v2000_v9 = vrot.slane %v1998_v63, 5 }
  0xd8   : > { %5703 = vmatprep.subr.bf16.mxu0 %v6228_v10 }
  0xdb   : > { %5704 = vmatpush3.bf16.msra.mxu0 %v6228_v10  ;;  %v4977_v10 = vld [vmem:[%s6446_s24 + $0x1c] sm:$0x1] }
  0xdc   : > { %5705 = vmatprep.subr.bf16.mxu0 %v6229_v11 }
  0xdf   : > { %5706 = vmatpush3.bf16.msra.mxu0 %v6229_v11  ;;  %v4979_v11 = vld [vmem:[%s6446_s24 + $0x24] sm:$0x1] }
  0xe0   : > { %5707 = vmatprep.subr.bf16.mxu0 %v6230_v12  ;;  %v2004_v23 = vshll.u32 %v4979_v11, 16  ;;  %v6271_v11 = vld [vmem:[%s7439_s4 + $0x58] sm:$0xff]  }
  0xe3   : > { %5708 = vmatpush3.bf16.msra.mxu0 %v6230_v12  ;;  %v4984_v12 = vld [vmem:[%s6446_s24 + $0x38] sm:$0xf] }
  0xe4   : > { %5717 = vmatprep.subr.bf16.mxu0 %v6232_v13  ;;  %v2037_v24 = vshrl.u32 %v4984_v12, 16 }
  0xe6   : > { %5710 = vmatmul.mubr.bf16.vlgmr.msra.gmra.mrb[0].mxu0 %v6233_v14  ;;  %v2014_v14 = vrot.slane %v2012_v2, 5  ;;  %v2039_v39 = vrot.slane %v2037_v24, 4  ;;  %v6263_v2 = vld [vmem:[%s6446_s24 + $0xd8] ss:$8 sps:$4 sm:$0xff]  }
  0xe7   : > { %5718 = vmatpush3.bf16.msra.mxu0 %v6232_v13  ;;  %5713 = vmatprep.mubr.bf16.mxu0 %v6239_v15  ;;  %v2011_v13 = vrot.slane %v2009_v1, 4  ;;  %v2025_v15 = vrot.slane %v2023_v3, 4  ;;  %v6264_v3 = vld [vmem:[%s6446_s24 + $0xe8] ss:$8 sps:$4 sm:$0xff]  }
  0xe8   : > { %5719 = vmatprep.subr.bf16.mxu0 %v6234_v16  ;;  %5781 = vmatprep.mubr.bf16.mxu1 %v6263_v2 }
  0xe9   : > { %v2015_v29 = vor.u32 %v2014_v14, %v2011_v13  ;;  %5782 = vmatmul.mubr.bf16.vlgmr.msra.gmra.mrb[0].mxu1 %v6264_v3  ;;  %v6273_v13 = vld [vmem:[%s7439_s4 + $0x60] sm:$0xff]  }
  0xea   : > { %v6274_v14 = vld [vmem:[%s7439_s4 + $0x220] sm:$0xff]  }
  0xeb   : > { %5720 = vmatpush3.bf16.msra.mxu0 %v6234_v16  ;;  %v2028_v16 = vrot.slane %v2026_v4, 5  ;;  %v6265_v4 = vld [vmem:[%s7439_s4 + $0x40] sm:$0xff]  }
  0xec   : > { %5721 = vmatprep.subr.bf16.mxu0 %v6235_v17  ;;  %5789 = vmatprep.subr.bf16.mxu1 %v6265_v4 }
  0xed   : > { %v2029_v31 = vor.u32 %v2028_v16, %v2025_v15  ;;  %5790 = vmatpush3.bf16.msra.mxu1 %v6265_v4  ;;  %v6275_v15 = vld [vmem:[%s7439_s4 + $0x68] sm:$0xff]   ;;  %v6276_v16 = vld [vmem:[%s6446_s24 + $0xf8] ss:$8 sps:$4 sm:$0xff]  }
  0xee   : > { %5714 = vmatmul.mubr.bf16.gmra.mrb[4].mxu0 %v6241_v18  ;;  %v4981_v18 = vld [vmem:[%s6446_s24 + $0x2c] sm:$0x1]  ;;  %5785 = vmatprep.mubr.bf16.mxu1 %v6276_v16 }
  0xef   : > { %5722 = vmatpush3.bf16.msra.mxu0 %v6235_v17  ;;  %5733 = vmatprep.mubr.bf16.mxu0 %v6243_v19  ;;  %v4986_v17 = vld [vmem:[%s6446_s24 + $0x40] sm:$0xf]  ;;  %v4983_v19 = vld [vmem:[%s6446_s24 + $0x34] sm:$0x1]  ;;  %v2030_v45 = vrot.slane %v2029_v31, 4 }
  0xf0   : > { %5723 = vmatprep.subr.bf16.mxu0 %v6236_v20  ;;  %v2051_v26 = vshrl.u32 %v4986_v17, 16  ;;  %v2054_v27 = vshll.u32 %v4986_v17, 16  ;;  %v2032_v32 = vshll.u32 %v4983_v19, 16  ;;  %v6277_v17 = vld [vmem:[%s7439_s4 + $0x228] sm:$0xff]   ;;  %v6279_v19 = vld [vmem:[%s7439_s4 + $0x70] sm:$0xff]  }
  0xf2   : > { %v2053_v41 = vrot.slane %v2051_v26, 4  ;;  %v2034_v47 = vrot.slane %v2032_v32, 5 }
  0xf3   : > { %5724 = vmatpush3.bf16.msra.mxu0 %v6236_v20  ;;  %v1987_v20 = vor.u32 %v1986_v7, %v1983_v6  ;;  %v6367_v6 = vmov 0   ;;  %v6267_v7 = vld [vmem:[%s7439_s4 + $0x48] sm:$0xff]  }
  0xf4   : > { %5725 = vmatprep.subr.bf16.mxu0 %v6237_v21  ;;  %v2035_v56 = vsel %vm6506_vm2, %v2030_v45, %v2034_v47  ;;  %2262 = vst [vmem:[#allocation2 + $0x18] sm:$0xf] %v6367_v6  ;;  %2263 = vst [vmem:[#allocation2 + $0x1c] sm:$0x1] %v6367_v6  ;;  %5791 = vmatprep.subr.bf16.mxu1 %v6267_v7 }
  0xf5   : > { %v1988_v34 = vrot.slane %v1987_v20, 4  ;;  %2256 = vst [vmem:[#allocation2] sm:$0xf] %v6367_v6  ;;  %2257 = vst [vmem:[#allocation2 + $0x4] sm:$0x1] %v6367_v6  ;;  %5792 = vmatpush3.bf16.msra.mxu1 %v6267_v7  ;;  %v6280_v20 = vld [vmem:[%s7439_s4 + $0x230] sm:$0xff]  }
  0xf6   : > { %2258 = vst [vmem:[#allocation2 + $0x8] sm:$0xf] %v6367_v6  ;;  %2259 = vst [vmem:[#allocation2 + $0xc] sm:$0x1] %v6367_v6 }
  0xf7   : > { %5726 = vmatpush3.bf16.msra.mxu0 %v6237_v21  ;;  %v1990_v21 = vshll.u32 %v4977_v10, 16  ;;  %2260 = vst [vmem:[#allocation2 + $0x10] sm:$0xf] %v6367_v6  ;;  %2261 = vst [vmem:[#allocation2 + $0x14] sm:$0x1] %v6367_v6  ;;  %v6270_v10 = vld [vmem:[%s7439_s4 + $0x210] sm:$0xff]  }
  0xf8   : > { %5727 = vmatprep.subr.bf16.mxu0 %v6238_v22  ;;  %2264 = vst [vmem:[#allocation2 + $0x20] sm:$0xf] %v6367_v6  ;;  %2265 = vst [vmem:[#allocation2 + $0x24] sm:$0x1] %v6367_v6 }
  0xf9   : > { %v1992_v35 = vrot.slane %v1990_v21, 5  ;;  %2266 = vst [vmem:[#allocation2 + $0x28] sm:$0xf] %v6367_v6  ;;  %2267 = vst [vmem:[#allocation2 + $0x2c] sm:$0x1] %v6367_v6  ;;  %v6281_v21 = vld [vmem:[%s7439_s4 + $0x78] sm:$0xff]  }
  0xfa   : > { %2268 = vst [vmem:[#allocation2 + $0x30] sm:$0xf] %v6367_v6  ;;  %2269 = vst [vmem:[#allocation2 + $0x34] sm:$0x1] %v6367_v6 }
  0xfb   : > { %5728 = vmatpush3.bf16.msra.mxu0 %v6238_v22  ;;  %v2001_v22 = vor.u32 %v2000_v9, %v1997_v8  ;;  %v1993_v49 = vsel %vm6506_vm2, %v1988_v34, %v1992_v35  ;;  %2270 = vst [vmem:[#allocation2 + $0x38] sm:$0xf] %v6367_v6  ;;  %2271 = vst [vmem:[#allocation2 + $0x3c] sm:$0x1] %v6367_v6  ;;  %v6268_v8 = vld [vmem:[%s7439_s4 + $0x208] sm:$0xff]   ;;  %v6269_v9 = vld [vmem:[%s7439_s4 + $0x50] sm:$0xff]  }
  0xfc   : > { %5729 = vmatprep.subr.bf16.mxu0 %v6240_v25  ;;  %2272 = vst [vmem:[#allocation2 + $0x40] sm:$0xf] %v6367_v6  ;;  %2273 = vst [vmem:[#allocation2 + $0x44] sm:$0x1] %v6367_v6  ;;  %5793 = vmatprep.subr.bf16.mxu1 %v6269_v9  ;;  %v6862_v24 = vld [vmem:[#allocation2] sm:$0xf] }
  0xfd   : > { %v2002_v36 = vrot.slane %v2001_v22, 4  ;;  %2274 = vst [vmem:[#allocation2 + $0x48] sm:$0xf] %v6367_v6  ;;  %2275 = vst [vmem:[#allocation2 + $0x4c] sm:$0x1] %v6367_v6  ;;  %5794 = vmatpush3.bf16.msra.mxu1 %v6269_v9  ;;  %v6282_v22 = vld [vmem:[%s7439_s4 + $0x238] sm:$0xff]  }
  0xfe   : > { %5795 = vmatprep.subr.bf16.mxu1 %v6271_v11  ;;  %v2662_v26 = vshll.u32 %v6862_v24, 16  ;;  %v2384_v6 = vld [vmem:[#allocation2 + $0x8] sm:$0xf] }
  0xff   : > { %5730 = vmatpush3.bf16.msra.mxu0 %v6240_v25  ;;  %v2040_v25 = vshll.u32 %v4984_v12, 16  ;;  %v6272_v12 = vld [vmem:[%s7439_s4 + $0x218] sm:$0xff]  }
 0x100   : > { %5731 = vmatprep.subr.bf16.mxu0 %v6242_v30  ;;  %v2664_v31 = vrot.slane %v2662_v26, 5  ;;  %v2408_v26 = vld [vmem:[#allocation2 + $0x24] sm:$0x1] }
 0x101   : > { %v2042_v40 = vrot.slane %v2040_v25, 5  ;;  %5796 = vmatpush3.bf16.msra.mxu1 %v6271_v11  ;;  %v2659_v25 = vshrl.u32 %v6862_v24, 16 }
 0x102   : > { %5797 = vmatprep.subr.bf16.mxu1 %v6273_v13 }
 0x103   : > { %5732 = vmatpush3.bf16.msra.mxu0 %v6242_v30  ;;  %v2018_v30 = vshll.u32 %v4981_v18, 16  ;;  %v2043_v52 = vor.u32 %v2042_v40, %v2039_v39  ;;  %v6278_v18 = vld [vmem:[%s6446_s24 + $0x108] ss:$8 sps:$4 sm:$0xff]   ;;  %v6880_v39 = vld [vmem:[#allocation2 + $0x4] sm:$0x1] }
 0x104   : > { %5741 = vmatprep.subr.bf16.mxu0 %v6244_v37  ;;  %5786 = vmatmul.mubr.bf16.gmra.mrb[4].mxu1 %v6278_v18 }
 0x105   : > { %v2044_v60 = vrot.slane %v2043_v52, 4  ;;  %5798 = vmatpush3.bf16.msra.mxu1 %v6273_v13  ;;  %v2390_v13 = vld [vmem:[#allocation2 + $0xc] sm:$0x1] }
 0x106   : > { %5734 = vmatmul.mubr.bf16.vlgmr.msra.gmra.mrb[0].mxu0 %v6245_v42  ;;  %v2056_v42 = vrot.slane %v2054_v27, 5  ;;  %5799 = vmatprep.subr.bf16.mxu1 %v6275_v15  ;;  %v6869_v27 = vld [vmem:[%s7437_s2] ss:$0 sm:$0xff] }
 0x107   : > { %5742 = vmatpush3.bf16.msra.mxu0 %v6244_v37  ;;  %5737 = vmatprep.mubr.bf16.mxu0 %v6251_v43  ;;  %v2006_v37 = vrot.slane %v2004_v23, 5  ;;  %v2016_v43 = vrot.slane %v2015_v29, 4  ;;  %v6859_v23 = vld [vmem:[%s7439_s4] sm:$0xff]  }
 0x108   : > { %5743 = vmatprep.subr.bf16.mxu0 %v6246_v44  ;;  %v6874_v29 = vld [vmem:[%s7438_s3] ss:$0 sm:$0xff] }
 0x109   : > { %v2007_v51 = vsel %vm6506_vm2, %v2002_v36, %v2006_v37  ;;  %5800 = vmatpush3.bf16.msra.mxu1 %v6275_v15 }
 0x10a   : > { %5801 = vmatprep.subr.bf16.mxu1 %v6279_v19 }
 0x10b   : > { %5744 = vmatpush3.bf16.msra.mxu0 %v6246_v44  ;;  %v2020_v44 = vrot.slane %v2018_v30, 5  ;;  %v2661_v30 = vrot.slane %v2659_v25, 4 }
 0x10c   : > { %5745 = vmatprep.subr.bf16.mxu0 %v6247_v50 }
 0x10d   : > { %v2021_v55 = vsel %vm6506_vm2, %v2016_v43, %v2020_v44  ;;  %5802 = vmatpush3.bf16.msra.mxu1 %v6279_v19  ;;  %v2668_v43 = vshll.u32 %v6880_v39, 16 }
 0x10e   : > { %5738 = vmatmul.mubr.bf16.gmra.mrb[4].mxu0 %v6252_v53  ;;  %v2057_v53 = vor.u32 %v2056_v42, %v2053_v41  ;;  %v5006_v59 = vcombine.low %v2021_v55, %v2035_v56  ;;  %5803 = vmatprep.subr.bf16.mxu1 %v6281_v21  ;;  %v2665_v42 = vor.u32 %v2664_v31, %v2661_v30 }
 0x10f   : > { %5746 = vmatpush3.bf16.msra.mxu0 %v6247_v50  ;;  %5757 = vmatprep.mubr.bf16.mxu0 %v5004_v54  ;;  %v2046_v50 = vshll.u32 %v4985_v38, 16  ;;  %v2060_v54 = vshll.u32 %v4987_v48, 16  ;;  %v6889_v55 = vrot.slane %v2668_v43, 5 }
 0x110   : > { %5747 = vmatprep.subr.bf16.mxu0 %v6248_v57  ;;  %v2058_v61 = vrot.slane %v2057_v53, 4 }
 0x111   : > { %v2048_v58 = vrot.slane %v2046_v50, 5  ;;  %v2062_v62 = vrot.slane %v2060_v54, 5  ;;  %5804 = vmatpush3.bf16.msra.mxu1 %v6281_v21  ;;  %v6887_v54 = vrot.slane %v2665_v42, 4 }
 0x112   : > { %5813 = vmatprep.subr.bf16.mxu1 %v6859_v23 }
 0x113   : > { %5748 = vmatpush3.bf16.msra.mxu0 %v6248_v57  ;;  %v5005_v57 = vcombine.low %v1993_v49, %v2007_v51  ;;  %v2049_v63 = vsel %vm6506_vm2, %v2044_v60, %v2048_v58 }
 0x114   : > { %5749 = vmatprep.subr.bf16.mxu0 %v6249_v0 }
 0x117   : > { %5750 = vmatpush3.bf16.msra.mxu0 %v6249_v0  ;;  %v2063_v0 = vsel %vm6506_vm2, %v2058_v61, %v2062_v62  ;;  %v2399_v61 = vld [vmem:[#allocation2 + $0x18] sm:$0xf]  ;;  %v2402_v62 = vld [vmem:[#allocation2 + $0x1c] sm:$0x1] }
 0x118   : > { %5751 = vmatprep.subr.bf16.mxu0 %v6250_v5  ;;  %v5007_v1 = vcombine.low %v2049_v63, %v2063_v0 }
 0x11b   : > { %5752 = vmatpush3.bf16.msra.mxu0 %v6250_v5  ;;  %v6266_v5 = vld [vmem:[%s7439_s4 + $0x200] sm:$0xff]  }
 0x11c   : > { %5753 = vmatprep.subr.bf16.mxu0 %v6253_v28 }
 0x11f   : > { %5754 = vmatpush3.bf16.msra.mxu0 %v6253_v28 }
 0x120   : > { %5755 = vmatprep.subr.bf16.mxu0 %v6254_v33 }
 0x123   : > { %5756 = vmatpush3.bf16.msra.mxu0 %v6254_v33 }
 0x124   : > { %5981 = vmatprep.subr.bf16.mxu0 %v6266_v5 }
 0x126   : > { %5758 = vmatmul.mubr.bf16.vlgmr.msra.gmra.mrb[0].mxu0 %v5005_v57 }
 0x127   : > { %5761 = vmatprep.mubr.bf16.mxu0 %v5006_v59  ;;  %5982 = vmatpush3.bf16.msra.mxu0 %v6266_v5 }
 0x128   : > { %5983 = vmatprep.subr.bf16.mxu0 %v6268_v8 }
 0x12b   : > { %5984 = vmatpush3.bf16.msra.mxu0 %v6268_v8 }
 0x12c   : > { %5985 = vmatprep.subr.bf16.mxu0 %v6270_v10 }
 0x12e   : > { %5762 = vmatmul.mubr.bf16.gmra.mrb[4].mxu0 %v5007_v1 }
 0x12f   : > { %5986 = vmatpush3.bf16.msra.mxu0 %v6270_v10 }
 0x130   : > { %5987 = vmatprep.subr.bf16.mxu0 %v6272_v12 }
 0x133   : > { %5988 = vmatpush3.bf16.msra.mxu0 %v6272_v12 }
 0x134   : > { %5989 = vmatprep.subr.bf16.mxu0 %v6274_v14 }
 0x137   : > { %5990 = vmatpush3.bf16.msra.mxu0 %v6274_v14 }
 0x138   : > { %5991 = vmatprep.subr.bf16.mxu0 %v6277_v17 }
 0x13b   : > { %5992 = vmatpush3.bf16.msra.mxu0 %v6277_v17 }
 0x13c   : > { %5993 = vmatprep.subr.bf16.mxu0 %v6280_v20 }
 0x13f   : > { %5994 = vmatpush3.bf16.msra.mxu0 %v6280_v20  ;;  %v2405_v20 = vld [vmem:[#allocation2 + $0x20] sm:$0xf] }
 0x140   : > { %5995 = vmatprep.subr.bf16.mxu0 %v6282_v22 }
 0x143   : > { %5996 = vmatpush3.bf16.msra.mxu0 %v6282_v22 }
 0x1f9   : > { %v5759_v28 = vpop.f32.mrb[0].mxu0 }
 0x1fa   : > { %v2227_v32 = vmul.f32 %v5759_v28, %v6869_v27  ;;  %v2179_v33 = vpop.f32.mrb[1].mxu0 }
 0x1fb   : > { %v2225_v34 = vmul.f32 %v6869_v27, %v2179_v33  ;;  %v5760_v35 = vpop.f32.mrb[2].mxu0 }
 0x1fc   : > { %v2242_v36 = vadd.f32 %v6874_v29, %v2227_v32  ;;  %v2228_v37 = vmul.f32 %v5760_v35, %v6869_v27  ;;  %v2182_v38 = vpop.f32.mrb[3].mxu0  ;;  %v2393_v35 = vld [vmem:[#allocation2 + $0x10] sm:$0xf] }
 0x1fd   : > { %v2240_v40 = vadd.f32 %v6874_v29, %v2225_v34  ;;  %v2226_v41 = vmul.f32 %v6869_v27, %v2182_v38 }
 0x1fe   : > { %v2250_v44 = vmax.f32 %v2242_v36, 0.0  ;;  %v2243_v45 = vadd.f32 %v6874_v29, %v2228_v37  ;;  %v2396_v36 = vld [vmem:[#allocation2 + $0x14] sm:$0x1] }
 0x1ff   : > { %v2248_v47 = vmax.f32 %v2240_v40, 0.0  ;;  %v2241_v48 = vadd.f32 %v6874_v29, %v2226_v41 }
 0x200   : > { %v5315_v49 = vpack.c.bf16 %v2250_v44, %v2250_v44  ;;  %v2251_v50 = vmax.f32 %v2243_v45, 0.0 }
 0x201   : > { %v5313_v51 = vpack.c.bf16 %v2248_v47, %v2248_v47  ;;  %v2249_v52 = vmax.f32 %v2241_v48, 0.0  ;;  %v5763_v53 = vpop.f32.mrb[4].mxu0 }
 0x202   : > { %v2317_v56 = vshrl.u32 %v5315_v49, 16  ;;  %v2320_v57 = vshll.u32 %v5315_v49, 16  ;;  %v5316_v58 = vpack.c.bf16 %v2251_v50, %v2251_v50  ;;  %v2231_v59 = vmul.f32 %v5763_v53, %v6869_v27  ;;  %v2195_v60 = vpop.f32.mrb[5].mxu0  ;;  %v2423_v53 = vld [vmem:[#allocation2 + $0x38] sm:$0xf] }
 0x203   : > { %v2301_v63 = vshrl.u32 %v5313_v51, 16  ;;  %v2304_v0 = vshll.u32 %v5313_v51, 16  ;;  %v5314_v1 = vpack.c.bf16 %v2249_v52, %v2249_v52  ;;  %v2229_v2 = vmul.f32 %v6869_v27, %v2195_v60  ;;  %v5764_v3 = vpop.f32.mrb[6].mxu0  ;;  %v2426_v60 = vld [vmem:[#allocation2 + $0x3c] sm:$0x1] }
 0x204   : > { %v2319_v4 = vrot.slane %v2317_v56, 7  ;;  %v2325_v7 = vshrl.u32 %v5316_v58, 16  ;;  %v2328_v8 = vshll.u32 %v5316_v58, 16  ;;  %v2246_v9 = vadd.f32 %v6874_v29, %v2231_v59  ;;  %v2198_v10 = vpop.f32.mrb[7].mxu0 }
 0x205   : > { %v2303_v12 = vrot.slane %v2301_v63, 7  ;;  %v2309_v14 = vshrl.u32 %v5314_v1, 16  ;;  %v2312_v15 = vshll.u32 %v5314_v1, 16  ;;  %v2244_v16 = vadd.f32 %v6874_v29, %v2229_v2  ;;  %v2411_v63 = vld [vmem:[#allocation2 + $0x28] sm:$0xf] }
 0x206   : > { %v2322_v17 = vor.u32 %v2320_v57, %v2319_v4  ;;  %v2323_v18 = vrot.slane %v2319_v4, 4  ;;  %v2327_v19 = vrot.slane %v2325_v7, 7  ;;  %v2254_v21 = vmax.f32 %v2246_v9, 0.0 }
 0x207   : > { %v2306_v22 = vor.u32 %v2304_v0, %v2303_v12  ;;  %v2307_v25 = vrot.slane %v2303_v12, 4  ;;  %v2311_v28 = vrot.slane %v2309_v14, 7  ;;  %v2252_v30 = vmax.f32 %v2244_v16, 0.0  ;;  %v2414_v0 = vld [vmem:[#allocation2 + $0x2c] sm:$0x1] }
 0x208   : > { %v2400_v31 = vsel %vm6895_vm7, %v2322_v17, %v2399_v61  ;;  %v2403_v32 = vsel %vm6902_vm8, %v2323_v18, %v2402_v62  ;;  %v2330_v33 = vor.u32 %v2328_v8, %v2327_v19  ;;  %v2331_v34 = vrot.slane %v2327_v19, 4  ;;  %v5047_v12 = vld [vmem:[%s7444_s9] ss:$0 sm:$0xff] }
 0x209   : > { %2401 = vst [vmem:[#allocation2 + $0x18] sm:$0xf] %v2400_v31  ;;  %2404 = vst [vmem:[#allocation2 + $0x1c] sm:$0x1] %v2403_v32  ;;  %v2385_v37 = vsel %vm6895_vm7, %v2306_v22, %v2384_v6  ;;  %v2391_v38 = vsel %vm6902_vm8, %v2307_v25, %v2390_v13  ;;  %v2314_v40 = vor.u32 %v2312_v15, %v2311_v28  ;;  %v2315_v41 = vrot.slane %v2311_v28, 4 }
 0x20a   : > { %2386 = vst [vmem:[#allocation2 + $0x8] sm:$0xf] %v2385_v37  ;;  %2392 = vst [vmem:[#allocation2 + $0xc] sm:$0x1] %v2391_v38  ;;  %v2406_v42 = vsel %vm6895_vm7, %v2330_v33, %v2405_v20  ;;  %v2409_v43 = vsel %vm6902_vm8, %v2331_v34, %v2408_v26  ;;  %v5319_v44 = vpack.c.bf16 %v2254_v21, %v2254_v21  ;;  %v2432_v31 = vld [vmem:[#allocation2 + $0x44] sm:$0x1] }
 0x20b   : > { %v5317_v45 = vpack.c.bf16 %v2252_v30, %v2252_v30  ;;  %2407 = vst [vmem:[#allocation2 + $0x20] sm:$0xf] %v2406_v42  ;;  %2410 = vst [vmem:[#allocation2 + $0x24] sm:$0x1] %v2409_v43  ;;  %v2394_v47 = vsel %vm6895_vm7, %v2314_v40, %v2393_v35  ;;  %v2397_v48 = vsel %vm6902_vm8, %v2315_v41, %v2396_v36  ;;  %v2429_v30 = vld [vmem:[#allocation2 + $0x40] sm:$0xf] }
 0x20c   : > { %v2232_v49 = vmul.f32 %v5764_v3, %v6869_v27  ;;  %v2230_v50 = vmul.f32 %v6869_v27, %v2198_v10  ;;  %2395 = vst [vmem:[#allocation2 + $0x10] sm:$0xf] %v2394_v47  ;;  %2398 = vst [vmem:[#allocation2 + $0x14] sm:$0x1] %v2397_v48  ;;  %v2349_v51 = vshrl.u32 %v5319_v44, 16  ;;  %v2352_v59 = vshll.u32 %v5319_v44, 16 }
 0x20d   : > { %v2333_v52 = vshrl.u32 %v5317_v45, 16  ;;  %v2336_v62 = vshll.u32 %v5317_v45, 16  ;;  %v2671_v2 = vsel %vm6506_vm2, %v6887_v54, %v6889_v55  ;;  %v2417_v32 = vld [vmem:[#allocation2 + $0x30] sm:$0xf]  ;;  %v2420_v44 = vld [vmem:[#allocation2 + $0x34] sm:$0x1] }
 0x20e   : > { %v2247_v56 = vadd.f32 %v6874_v29, %v2232_v49  ;;  %v2245_v57 = vadd.f32 %v6874_v29, %v2230_v50  ;;  %v2351_v58 = vrot.slane %v2349_v51, 7 }
 0x20f   : > { %v2335_v61 = vrot.slane %v2333_v52, 7 }
 0x210   : > { %v2255_v1 = vmax.f32 %v2247_v56, 0.0  ;;  %v2253_v27 = vmax.f32 %v2245_v57, 0.0  ;;  %v2354_v3 = vor.u32 %v2352_v59, %v2351_v58  ;;  %v2355_v4 = vrot.slane %v2351_v58, 4  ;;  %v6931_v7 = vld [vmem:[#allocation2 + $0x1c] sm:$0x1] }
 0x211   : > { %v2338_v6 = vor.u32 %v2336_v62, %v2335_v61  ;;  %v2339_v29 = vrot.slane %v2335_v61, 4  ;;  %v4382_v8 = vld [vmem:[#allocation2 + $0x18] sm:$0xe]  ;;  %v4411_v14 = vrot.slane %v6931_v7, 5  ;;  %v6940_v15 = vld [vmem:[#allocation2 + $0x8] sm:$0xf] }
 0x212   : > { %v5320_v9 = vpack.c.bf16 %v2255_v1, %v2255_v1  ;;  %v5318_v10 = vpack.c.bf16 %v2253_v27, %v2253_v27  ;;  %v5273_v13 = vrot.slane %v4382_v8, 9  ;;  %v2424_v16 = vsel %vm6895_vm7, %v2354_v3, %v2423_v53  ;;  %v6950_v20 = vld [vmem:[#allocation2 + $0xc] sm:$0x1]  ;;  %v6964_v56 = vld [vmem:[#allocation2 + $0x18] sm:$0xf] }
 0x213   : > { %v2427_v17 = vsel %vm6902_vm8, %v2355_v4, %v2426_v60  ;;  %v2412_v18 = vsel %vm6895_vm7, %v2338_v6, %v2411_v63  ;;  %v2415_v19 = vsel %vm6902_vm8, %v2339_v29, %v2414_v0  ;;  %2425 = vst [vmem:[#allocation2 + $0x38] sm:$0xf] %v2424_v16  ;;  %v6952_v28 = vld [vmem:[#allocation2 + $0x14] sm:$0x1]  ;;  %v4381_v33 = vld [vmem:[#allocation2 + $0x10] sm:$0xe] }
 0x214   : > { %2428 = vst [vmem:[#allocation2 + $0x3c] sm:$0x1] %v2427_v17  ;;  %2413 = vst [vmem:[#allocation2 + $0x28] sm:$0xf] %v2412_v18  ;;  %v2357_v21 = vshrl.u32 %v5320_v9, 16  ;;  %v2360_v22 = vshll.u32 %v5320_v9, 16  ;;  %v4412_v35 = vsel %vm6935_vm11, %v5273_v13, %v4411_v14 }
 0x215   : > { %2416 = vst [vmem:[#allocation2 + $0x2c] sm:$0x1] %v2415_v19  ;;  %v2341_v25 = vshrl.u32 %v5318_v10, 16  ;;  %v2344_v26 = vshll.u32 %v5318_v10, 16  ;;  %v4407_v34 = vrot.slane %v6952_v28, 5  ;;  %v2673_v36 = vshrl.u32 %v6940_v15, 16 }
 0x216   : > { %v2676_v37 = vshll.u32 %v6940_v15, 16  ;;  %v2359_v38 = vrot.slane %v2357_v21, 7  ;;  %v5272_v41 = vrot.slane %v4381_v33, 9  ;;  %v2682_v42 = vshll.u32 %v6950_v20, 16  ;;  %v6960_v43 = vld [vmem:[#allocation2 + $0x10] sm:$0xf] }
 0x217   : > { %v2343_v40 = vrot.slane %v2341_v25, 7  ;;  %v2675_v45 = vrot.slane %v2673_v36, 4  ;;  %v2687_v48 = vshrl.u32 %v6960_v43, 16  ;;  %v2690_v49 = vshll.u32 %v6960_v43, 16  ;;  %v6966_v57 = vld [vmem:[#allocation2 + $0x14] sm:$0x1] }
 0x218   : > { %v2678_v47 = vrot.slane %v2676_v37, 5  ;;  %v2362_v50 = vor.u32 %v2360_v22, %v2359_v38  ;;  %v2363_v51 = vrot.slane %v2359_v38, 4  ;;  %v4408_v58 = vsel %vm6935_vm11, %v5272_v41, %v4407_v34  ;;  %v6970_v61 = vld [vmem:[#allocation2 + $0x1c] sm:$0x1]  ;;  %v4383_v63 = vld [vmem:[#allocation2 + $0x20] sm:$0xe] }
 0x219   : > { %v2346_v52 = vor.u32 %v2344_v26, %v2343_v40  ;;  %v2347_v53 = vrot.slane %v2343_v40, 4  ;;  %v2684_v60 = vrot.slane %v2682_v42, 5  ;;  %v2689_v62 = vrot.slane %v2687_v48, 4  ;;  %v6980_v4 = vld [vmem:[#allocation2 + $0x24] sm:$0x1] }
 0x21a   : > { %v2679_v59 = vor.u32 %v2678_v47, %v2675_v45  ;;  %v2430_v0 = vsel %vm6895_vm7, %v2362_v50, %v2429_v30  ;;  %v2433_v1 = vsel %vm6902_vm8, %v2363_v51, %v2432_v31  ;;  %v5296_v6 = vcombine.low %v4408_v58, %v4412_v35  ;;  %v6991_v22 = vld [vmem:[#allocation2 + $0x20] sm:$0xf]  ;;  %v6993_v25 = vld [vmem:[#allocation2 + $0x24] sm:$0x1] }
 0x21b   : > { %v2418_v27 = vsel %vm6895_vm7, %v2346_v52, %v2417_v32  ;;  %v2421_v3 = vsel %vm6902_vm8, %v2347_v53, %v2420_v44  ;;  %2431 = vst [vmem:[#allocation2 + $0x40] sm:$0xf] %v2430_v0  ;;  %2434 = vst [vmem:[#allocation2 + $0x44] sm:$0x1] %v2433_v1  ;;  %v2692_v8 = vrot.slane %v2690_v49, 5  ;;  %v2696_v9 = vshll.u32 %v6966_v57, 16 }
 0x21c   : > { %2419 = vst [vmem:[#allocation2 + $0x30] sm:$0xf] %v2418_v27  ;;  %2422 = vst [vmem:[#allocation2 + $0x34] sm:$0x1] %v2421_v3  ;;  %v2680_v29 = vrot.slane %v2679_v59, 4  ;;  %v2701_v13 = vshrl.u32 %v6964_v56, 16  ;;  %5997 = vmatprep.mubr.bf16.mxu0 %v5296_v6 }
 0x21d   : > { %v6983_v10 = vld [vmem:[#allocation2 + $0x2c] sm:$0x1]  ;;  %v2704_v5 = vshll.u32 %v6964_v56, 16  ;;  %v2710_v11 = vshll.u32 %v6970_v61, 16  ;;  %v4384_v14 = vld [vmem:[#allocation2 + $0x28] sm:$0xe]  ;;  %v2693_v18 = vor.u32 %v2692_v8, %v2689_v62 }
 0x21e   : > { %v5274_v16 = vrot.slane %v4383_v63, 9  ;;  %v2685_v17 = vsel %vm6506_vm2, %v2680_v29, %v2684_v60  ;;  %v2698_v19 = vrot.slane %v2696_v9, 5  ;;  %v4415_v21 = vrot.slane %v6980_v4, 5  ;;  %v7000_v33 = vld [vmem:[#allocation2 + $0x28] sm:$0xf] }
 0x21f   : > { %v5064_v26 = vcombine.low %v2671_v2, %v2685_v17  ;;  %v2703_v30 = vrot.slane %v2701_v13, 4  ;;  %v2706_v31 = vrot.slane %v2704_v5, 5  ;;  %v2712_v32 = vrot.slane %v2710_v11, 5  ;;  %v7005_v40 = vld [vmem:[#allocation2 + $0x2c] sm:$0x1] }
 0x220   : > { %v2694_v34 = vrot.slane %v2693_v18, 4  ;;  %v4416_v35 = vsel %vm6935_vm11, %v5274_v16, %v4415_v21  ;;  %v5275_v36 = vrot.slane %v4384_v14, 9  ;;  %v4419_v37 = vrot.slane %v6983_v10, 5  ;;  %v7019_v59 = vld [vmem:[#allocation2 + $0x38] sm:$0xf]  ;;  %v6284_v3 = vld [vmem:[%s7439_s4 + $0x8] sm:$0xff]  }
 0x221   : > { %5805 = vmatprep.mubr.bf16.mxu1 %v5064_v26  ;;  %v2707_v38 = vor.u32 %v2706_v31, %v2703_v30  ;;  %v2715_v41 = vshrl.u32 %v6991_v22, 16  ;;  %v2718_v54 = vshll.u32 %v6991_v22, 16  ;;  %v2724_v55 = vshll.u32 %v6993_v25, 16  ;;  %v7030_v8 = vld [vmem:[#allocation2 + $0x3c] sm:$0x1]  ;;  %v6285_v21 = vld [vmem:[%s7439_s4 + $0x10] sm:$0xff]  }
 0x222   : > { %v2699_v2 = vsel %vm6506_vm2, %v2694_v34, %v2698_v19  ;;  %v4420_v42 = vsel %vm6935_vm11, %v5275_v36, %v4419_v37  ;;  %v2729_v44 = vshrl.u32 %v7000_v33, 16  ;;  %v2732_v45 = vshll.u32 %v7000_v33, 16  ;;  %v3055_v19 = vld [vmem:[#allocation2 + $0x10] sm:$0xe]  ;;  %v3056_v36 = vld [vmem:[#allocation2 + $0x18] sm:$0xe] }
 0x223   : > { %v2708_v47 = vrot.slane %v2707_v38, 4  ;;  %v5297_v48 = vcombine.low %v4416_v35, %v4420_v42  ;;  %v2717_v49 = vrot.slane %v2715_v41, 4  ;;  %v2720_v50 = vrot.slane %v2718_v54, 5  ;;  %v7016_v51 = vld [vmem:[#allocation2 + $0x30] sm:$0xf] }
 0x224   : > { %v2731_v52 = vrot.slane %v2729_v44, 4  ;;  %v2734_v53 = vrot.slane %v2732_v45, 5  ;;  %v2738_v58 = vshll.u32 %v7005_v40, 16  ;;  %v7023_v63 = vld [vmem:[#allocation2 + $0x34] sm:$0x1]  ;;  %v2743_v0 = vshrl.u32 %v7016_v51, 16 }
 0x225   : > { %v2713_v60 = vsel %vm6506_vm2, %v2708_v47, %v2712_v32  ;;  %5998 = vmatmul.mubr.bf16.vlgmr.msra.gmra.mrb[8].mxu0 %v5297_v48  ;;  %v2721_v62 = vor.u32 %v2720_v50, %v2717_v49  ;;  %v2746_v1 = vshll.u32 %v7016_v51, 16  ;;  %v2726_v6 = vrot.slane %v2724_v55, 5  ;;  %v6287_v48 = vld [vmem:[%s7439_s4 + $0x18] sm:$0xff]  }
 0x226   : > { %v5065_v27 = vcombine.low %v2699_v2, %v2713_v60  ;;  %v2735_v29 = vor.u32 %v2734_v53, %v2731_v52  ;;  %v2745_v13 = vrot.slane %v2743_v0, 4  ;;  %v2757_v11 = vshrl.u32 %v7019_v59, 16  ;;  %v6289_v60 = vld [vmem:[%s7439_s4 + $0x28] sm:$0xff]   ;;  %v3053_v0 = vld [vmem:[#allocation2] sm:$0xe] }
 0x227   : > { %v2722_v9 = vrot.slane %v2721_v62, 4  ;;  %v2748_v5 = vrot.slane %v2746_v1, 5  ;;  %v2740_v16 = vrot.slane %v2738_v58, 5  ;;  %v2752_v17 = vshll.u32 %v7023_v63, 16  ;;  %v6288_v58 = vld [vmem:[%s7439_s4 + $0x20] sm:$0xff]   ;;  %v6290_v62 = vld [vmem:[%s7439_s4 + $0x30] sm:$0xff]  }
 0x228   : > { %5806 = vmatmul.mubr.bf16.vlgmr.msra.gmra.mrb[8].mxu1 %v5065_v27  ;;  %v2736_v14 = vrot.slane %v2735_v29, 4  ;;  %v2760_v18 = vshll.u32 %v7019_v59, 16  ;;  %v2759_v30 = vrot.slane %v2757_v11, 4  ;;  %v2766_v35 = vshll.u32 %v7030_v8, 16  ;;  %v3054_v1 = vld [vmem:[#allocation2 + $0x8] sm:$0xe] }
 0x229   : > { %5814 = vmatpush3.bf16.msra.mxu1 %v6859_v23  ;;  %v2749_v26 = vor.u32 %v2748_v5, %v2745_v13  ;;  %v2727_v31 = vsel %vm6506_vm2, %v2722_v9, %v2726_v6  ;;  %v2754_v23 = vrot.slane %v2752_v17, 5  ;;  %v5090_v54 = vrot.slane %v3055_v19, 9  ;;  %v4101_v11 = vld [vmem:[#allocation2 + $0x18] sm:$0xf] }
 0x22a   : > { %5815 = vmatprep.subr.bf16.mxu1 %v6284_v3  ;;  %v2741_v32 = vsel %vm6506_vm2, %v2736_v14, %v2740_v16  ;;  %v2762_v34 = vrot.slane %v2760_v18, 5  ;;  %v3090_v55 = vrot.slane %v6966_v57, 5  ;;  %v5091_v2 = vrot.slane %v3056_v36, 9  ;;  %v4103_v14 = vld [vmem:[#allocation2 + $0x20] sm:$0xf]  ;;  %v6298_v18 = vld [vmem:[%s7439_s4 + $0x98] sm:$0xff]  }
 0x22b   : > { %v5066_v37 = vcombine.low %v2727_v31, %v2741_v32  ;;  %v2750_v38 = vrot.slane %v2749_v26, 4  ;;  %v3094_v42 = vrot.slane %v6970_v61, 5  ;;  %v2768_v47 = vrot.slane %v2766_v35, 5  ;;  %v4105_v26 = vld [vmem:[#allocation2 + $0x28] sm:$0xf] }
 0x22c   : > { %v2763_v41 = vor.u32 %v2762_v34, %v2759_v30  ;;  %v7053_v49 = vsel %vm6935_vm11, %v5090_v54, %v3090_v55  ;;  %v5076_v53 = vcombine.low %v6862_v24, %v6940_v15  ;;  %v6291_v24 = vld [vmem:[%s7439_s4 + $0x38] sm:$0xff]   ;;  %v6293_v15 = vld [vmem:[%s7439_s4 + $0x80] sm:$0xff]   ;;  %v5077_v27 = vcombine.low %v6960_v43, %v6964_v56  ;;  %v6297_v43 = vld [vmem:[%s7439_s4 + $0x90] sm:$0xff]  }
 0x22d   : > { %5816 = vmatpush3.bf16.msra.mxu1 %v6284_v3  ;;  %5809 = vmatprep.mubr.bf16.mxu1 %v5066_v37  ;;  %v2755_v44 = vsel %vm6506_vm2, %v2750_v38, %v2754_v23  ;;  %v7057_v57 = vsel %vm6935_vm11, %v5091_v2, %v3094_v42  ;;  %v6295_v3 = vld [vmem:[%s7439_s4 + $0x88] sm:$0xff]   ;;  %v5078_v6 = vcombine.low %v6991_v22, %v7000_v33  ;;  %v5088_v29 = vrot.slane %v3053_v0, 9  ;;  %v4099_v56 = vld [vmem:[#allocation2 + $0x10] sm:$0xf] }
 0x22e   : > { %5817 = vmatprep.subr.bf16.mxu1 %v6285_v21  ;;  %v2764_v45 = vrot.slane %v2763_v41, 4  ;;  %v5113_v50 = vcombine.low %v7053_v49, %v7057_v57  ;;  %v3082_v9 = vrot.slane %v6880_v39, 5  ;;  %v5089_v13 = vrot.slane %v3054_v1, 9  ;;  %v6307_v49 = vld [vmem:[%s7439_s4 + $0xd8] sm:$0xff]   ;;  %v6306_v57 = vld [vmem:[#allocation2 + $0x8] ss:$8 sps:$4 sm:$0xff]  }
 0x22f   : > { %v3086_v5 = vrot.slane %v6950_v20, 5  ;;  %v4116_v39 = vshrl.u32 %v4099_v56, 16  ;;  %v4119_v16 = vshll.u32 %v4099_v56, 16  ;;  %v4130_v20 = vshrl.u32 %v4101_v11, 16  ;;  %v6302_v56 = vld [vmem:[%s7439_s4 + $0xb8] sm:$0xff]  }
 0x230   : > { %v2769_v61 = vsel %vm6506_vm2, %v2764_v45, %v2768_v47  ;;  %v3083_v22 = vsel %vm6935_vm11, %v5088_v29, %v3082_v9  ;;  %v5079_v17 = vcombine.low %v7016_v51, %v7019_v59  ;;  %v4125_v19 = vshll.u32 %v6952_v28, 16  ;;  %v6299_v28 = vld [vmem:[%s7439_s4 + $0xa0] sm:$0xff]  }
 0x231   : > { %v5067_v52 = vcombine.low %v2755_v44, %v2769_v61  ;;  %5818 = vmatpush3.bf16.msra.mxu1 %v6285_v21  ;;  %v3087_v33 = vsel %vm6935_vm11, %v5089_v13, %v3086_v5  ;;  %v4133_v21 = vshll.u32 %v4101_v11, 16  ;;  %v4144_v30 = vshrl.u32 %v4103_v14, 16  ;;  %v3057_v11 = vld [vmem:[#allocation2 + $0x20] sm:$0xe] }
 0x232   : > { %5819 = vmatprep.subr.bf16.mxu1 %v6287_v48  ;;  %v5112_v31 = vcombine.low %v3083_v22, %v3087_v33  ;;  %v4118_v32 = vrot.slane %v4116_v39, 4  ;;  %v4121_v34 = vrot.slane %v4119_v16, 5  ;;  %v4139_v35 = vshll.u32 %v6931_v7, 16  ;;  %v6303_v33 = vld [vmem:[%s7439_s4 + $0xc0] sm:$0xff]  }
 0x233   : > { %5810 = vmatmul.mubr.bf16.gmra.mrb[12].mxu1 %v5067_v52  ;;  %v4132_v36 = vrot.slane %v4130_v20, 4  ;;  %v4135_v37 = vrot.slane %v4133_v21, 5  ;;  %v4146_v59 = vrot.slane %v4144_v30, 4  ;;  %v4147_v38 = vshll.u32 %v4103_v14, 16 }
 0x234   : > { %5829 = vmatprep.mubr.bf16.mxu1 %v5076_v53  ;;  %v4122_v51 = vor.u32 %v4121_v34, %v4118_v32  ;;  %v4158_v23 = vshrl.u32 %v4105_v26, 16  ;;  %v4127_v41 = vrot.slane %v4125_v19, 5  ;;  %v4161_v55 = vshll.u32 %v4105_v26, 16  ;;  %v3060_v19 = vld [vmem:[#allocation2 + $0x38] sm:$0xe]  ;;  %v6305_v32 = vld [vmem:[%s7439_s4 + $0xd0] sm:$0xff]  }
 0x235   : > { %5820 = vmatpush3.bf16.msra.mxu1 %v6287_v48  ;;  %v4136_v54 = vor.u32 %v4135_v37, %v4132_v36  ;;  %v4141_v42 = vrot.slane %v4139_v35, 5  ;;  %v4149_v7 = vrot.slane %v4147_v38, 5  ;;  %v4153_v47 = vshll.u32 %v6980_v4, 16  ;;  %v6308_v36 = vld [vmem:[%s7439_s4 + $0xe0] sm:$0xff]   ;;  %v3438_v38 = vld [vmem:[#allocation2 + $0x10] sm:$0xf] }
 0x236   : > { %5821 = vmatprep.subr.bf16.mxu1 %v6288_v58  ;;  %v4123_v2 = vrot.slane %v4122_v51, 4  ;;  %v4160_v44 = vrot.slane %v4158_v23, 4  ;;  %v4163_v48 = vrot.slane %v4161_v55, 5  ;;  %v4167_v61 = vshll.u32 %v6983_v10, 16  ;;  %v6310_v23 = vld [vmem:[%s7439_s4 + $0xf0] sm:$0xff]   ;;  %v6311_v55 = vld [vmem:[%s7439_s4 + $0xf8] sm:$0xff]  }
 0x237   : > { %v4137_v45 = vrot.slane %v4136_v54, 4  ;;  %v4150_v53 = vor.u32 %v4149_v7, %v4146_v59  ;;  %v4155_v10 = vrot.slane %v4153_v47, 5  ;;  %v3102_v22 = vrot.slane %v7005_v40, 5  ;;  %v6304_v40 = vld [vmem:[%s7439_s4 + $0xc8] sm:$0xff]  }
 0x238   : > { %v4128_v52 = vsel %vm6506_vm2, %v4123_v2, %v4127_v41  ;;  %v4169_v1 = vrot.slane %v4167_v61, 5  ;;  %v5092_v39 = vrot.slane %v3057_v11, 9  ;;  %v3098_v16 = vrot.slane %v6993_v25, 5  ;;  %v6309_v59 = vld [vmem:[%s7439_s4 + $0xe8] sm:$0xff]   ;;  %v7187_v61 = vld [vmem:[#allocation2 + $0x14] sm:$0x1] }
 0x239   : > { %5822 = vmatpush3.bf16.msra.mxu1 %v6288_v58  ;;  %v6300_v58 = vld [vmem:[%s7439_s4 + $0xa8] sm:$0xff]   ;;  %v3106_v30 = vrot.slane %v7023_v63, 5  ;;  %v5095_v25 = vrot.slane %v3060_v19, 9  ;;  %v3467_v41 = vshrl.u32 %v3438_v38, 16  ;;  %v3470_v54 = vshll.u32 %v3438_v38, 16 }
 0x23a   : > { %5823 = vmatprep.subr.bf16.mxu1 %v6289_v60  ;;  %v6316_v11 = vld [vmem:[#allocation2 + $0x38] ss:$8 sps:$4 sm:$0xff]   ;;  %v3444_v19 = vld [vmem:[#allocation2 + $0x28] sm:$0xf] }
 0x23b   : > { %v3469_v7 = vrot.slane %v3467_v41, 4 }
 0x23d   : > { %5824 = vmatpush3.bf16.msra.mxu1 %v6289_v60  ;;  %v7113_v60 = vpop.f32.mrb[0].mxu1 }
 0x23e   : > { %5825 = vmatprep.subr.bf16.mxu1 %v6290_v62 }
 0x241   : > { %5826 = vmatpush3.bf16.msra.mxu1 %v6290_v62  ;;  %v4142_v62 = vsel %vm6506_vm2, %v4137_v45, %v4141_v42  ;;  %v6313_v45 = vld [vmem:[%s7439_s4 + $0x100] sm:$0xff]  }
 0x242   : > { %5827 = vmatprep.subr.bf16.mxu1 %v6291_v24  ;;  %v7117_v4 = vcombine.low %v4128_v52, %v4142_v62  ;;  %v6315_v62 = vld [vmem:[%s7439_s4 + $0x108] sm:$0xff]  }
 0x245   : > { %5828 = vmatpush3.bf16.msra.mxu1 %v6291_v24  ;;  %v4164_v24 = vor.u32 %v4163_v48, %v4160_v44  ;;  %v3472_v44 = vrot.slane %v3470_v54, 5 }
 0x246   : > { %5837 = vmatprep.subr.bf16.mxu1 %v6293_v15 }
 0x247   : > { %v4165_v0 = vrot.slane %v4164_v24, 4  ;;  %v3473_v52 = vor.u32 %v3472_v44, %v3469_v7 }
 0x248   : > { %5830 = vmatmul.mubr.bf16.vlgmr.msra.gmra.mrb[8].mxu1 %v5077_v27  ;;  %v7119_v27 = vpop.f32.mrb[1].mxu1 }
 0x249   : > { %5833 = vmatprep.mubr.bf16.mxu1 %v5078_v6  ;;  %5838 = vmatpush3.bf16.msra.mxu1 %v6293_v15  ;;  %v4151_v15 = vrot.slane %v4150_v53, 4  ;;  %v7124_v6 = vpop.f32.mrb[2].mxu1  ;;  %v4170_v9 = vsel %vm6506_vm2, %v4165_v0, %v4169_v1  ;;  %v7189_v53 = vld [vmem:[#allocation2 + $0xc] sm:$0x1]  ;;  %v3474_v1 = vrot.slane %v3473_v52, 4 }
 0x24a   : > { %5839 = vmatprep.subr.bf16.mxu1 %v6295_v3  ;;  %v7130_v13 = vpop.f32.mrb[3].mxu1  ;;  %v3462_v0 = vshll.u32 %v7189_v53, 16 }
 0x24b   : > { %v4156_v29 = vsel %vm6506_vm2, %v4151_v15, %v4155_v10  ;;  %v3476_v15 = vshll.u32 %v7187_v61, 16  ;;  %v6314_v10 = vld [vmem:[#allocation2 + $0x28] ss:$8 sps:$4 sm:$0xff]  }
 0x24c   : > { %v7132_v5 = vcombine.low %v4156_v29, %v4170_v9 }
 0x24d   : > { %5840 = vmatpush3.bf16.msra.mxu1 %v6295_v3  ;;  %v6301_v3 = vld [vmem:[%s7439_s4 + $0xb0] sm:$0xff]   ;;  %v3478_v9 = vrot.slane %v3476_v15, 5  ;;  %v6322_v15 = vld [vmem:[%s7439_s4 + $0x138] sm:$0xff]  }
 0x24e   : > { %5841 = vmatprep.subr.bf16.mxu1 %v6297_v43 }
 0x250   : > { %5834 = vmatmul.mubr.bf16.gmra.mrb[12].mxu1 %v5079_v17  ;;  %v3059_v17 = vld [vmem:[#allocation2 + $0x30] sm:$0xe] }
 0x251   : > { %5842 = vmatpush3.bf16.msra.mxu1 %v6297_v43  ;;  %5853 = vmatprep.mubr.bf16.mxu1 %v5112_v31  ;;  %v3058_v43 = vld [vmem:[#allocation2 + $0x28] sm:$0xe]  ;;  %v5094_v26 = vrot.slane %v3059_v17, 9  ;;  %v3110_v31 = vrot.slane %v7030_v8, 5  ;;  %v7164_v8 = vpop.f32.mrb[4].mxu1 }
 0x252   : > { %5843 = vmatprep.subr.bf16.mxu1 %v6298_v18  ;;  %v5093_v14 = vrot.slane %v3058_v43, 9  ;;  %v3464_v43 = vrot.slane %v3462_v0, 5  ;;  %v3440_v17 = vld [vmem:[#allocation2 + $0x18] sm:$0xf] }
 0x253   : > { %v3107_v34 = vsel %vm6935_vm11, %v5094_v26, %v3106_v30  ;;  %v3111_v63 = vsel %vm6935_vm11, %v5095_v25, %v3110_v31  ;;  %v3481_v30 = vshrl.u32 %v3440_v17, 16  ;;  %v3484_v25 = vshll.u32 %v3440_v17, 16  ;;  %v6320_v31 = vld [vmem:[%s7439_s4 + $0x128] sm:$0xff]   ;;  %v7233_v17 = vld [vmem:[#allocation2 + $0x44] sm:$0x1] }
 0x254   : > { %v3103_v20 = vsel %vm6935_vm11, %v5093_v14, %v3102_v22  ;;  %v5115_v35 = vcombine.low %v3107_v34, %v3111_v63  ;;  %v6318_v22 = vld [vmem:[%s7439_s4 + $0x118] sm:$0xff]   ;;  %v3512_v34 = vshll.u32 %v3444_v19, 16 }
 0x255   : > { %5844 = vmatpush3.bf16.msra.mxu1 %v6298_v18  ;;  %v3099_v18 = vsel %vm6935_vm11, %v5092_v39, %v3098_v16  ;;  %v3442_v39 = vld [vmem:[#allocation2 + $0x20] sm:$0xf]  ;;  %v3446_v16 = vld [vmem:[#allocation2 + $0x30] sm:$0xf]  ;;  %v3483_v38 = vrot.slane %v3481_v30, 4 }
 0x256   : > { %5845 = vmatprep.subr.bf16.mxu1 %v6299_v28  ;;  %v5114_v21 = vcombine.low %v3099_v18, %v3103_v20  ;;  %v6319_v20 = vld [vmem:[%s7439_s4 + $0x120] sm:$0xff]   ;;  %v3495_v18 = vshrl.u32 %v3442_v39, 16  ;;  %v3526_v26 = vshll.u32 %v3446_v16, 16  ;;  %v3514_v54 = vrot.slane %v3512_v34, 5  ;;  %v7239_v30 = vld [vmem:[#allocation2 + $0x3c] sm:$0x1] }
 0x257   : > { %v3719_v34 = vld [vmem:[#allocation2 + $0x10] sm:$0xe] }
 0x258   : > { %v3497_v63 = vrot.slane %v3495_v18, 4 }
 0x259   : > { %5846 = vmatpush3.bf16.msra.mxu1 %v6299_v28  ;;  %v3436_v28 = vld [vmem:[#allocation2 + $0x8] sm:$0xf] }
 0x25a   : > { %5847 = vmatprep.subr.bf16.mxu1 %v6300_v58  ;;  %v3453_v2 = vshrl.u32 %v3436_v28, 16  ;;  %v3456_v42 = vshll.u32 %v3436_v28, 16  ;;  %v7215_v28 = vld [vmem:[#allocation2 + $0x24] sm:$0x1] }
 0x25b   : > { %v3504_v52 = vshll.u32 %v7215_v28, 16 }
 0x25c   : > { %v3455_v47 = vrot.slane %v3453_v2, 4  ;;  %v3458_v48 = vrot.slane %v3456_v42, 5  ;;  %v7217_v42 = vld [vmem:[#allocation2 + $0x34] sm:$0x1] }
 0x25d   : > { %5848 = vmatpush3.bf16.msra.mxu1 %v6300_v58  ;;  %v6312_v58 = vld [vmem:[#allocation2 + $0x18] ss:$8 sps:$4 sm:$0xff]   ;;  %v3532_v0 = vshll.u32 %v7217_v42, 16 }
 0x25e   : > { %5849 = vmatprep.subr.bf16.mxu1 %v6301_v3  ;;  %v3459_v24 = vor.u32 %v3458_v48, %v3455_v47 }
 0x260   : > { %v3460_v29 = vrot.slane %v3459_v24, 4 }
 0x261   : > { %5850 = vmatpush3.bf16.msra.mxu1 %v6301_v3  ;;  %v6317_v3 = vld [vmem:[%s7439_s4 + $0x110] sm:$0xff]  }
 0x262   : > { %5851 = vmatprep.subr.bf16.mxu1 %v6302_v56  ;;  %v3465_v14 = vsel %vm6506_vm2, %v3460_v29, %v3464_v43 }
 0x265   : > { %5852 = vmatpush3.bf16.msra.mxu1 %v6302_v56  ;;  %v3479_v56 = vsel %vm6506_vm2, %v3474_v1, %v3478_v9 }
 0x266   : > { %5861 = vmatprep.subr.bf16.mxu1 %v6303_v33 }
 0x268   : > { %5854 = vmatmul.mubr.bf16.vlgmr.msra.gmra.mrb[8].mxu1 %v5113_v50  ;;  %v7166_v50 = vpop.f32.mrb[5].mxu1 }
 0x269   : > { %5857 = vmatprep.mubr.bf16.mxu1 %v5114_v21  ;;  %5862 = vmatpush3.bf16.msra.mxu1 %v6303_v33  ;;  %v7171_v37 = vpop.f32.mrb[6].mxu1  ;;  %v5168_v33 = vcombine.low %v3465_v14, %v3479_v56  ;;  %v3523_v21 = vshrl.u32 %v3446_v16, 16  ;;  %v3506_v14 = vrot.slane %v3504_v52, 5 }
 0x26a   : > { %5863 = vmatprep.subr.bf16.mxu1 %v6304_v40  ;;  %v7173_v51 = vpop.f32.mrb[7].mxu1 }
 0x26d   : > { %5864 = vmatpush3.bf16.msra.mxu1 %v6304_v40  ;;  %v3498_v40 = vshll.u32 %v3442_v39, 16  ;;  %v6323_v39 = vld [vmem:[%s7439_s4 + $0x140] sm:$0xff]  }
 0x26e   : > { %5865 = vmatprep.subr.bf16.mxu1 %v6305_v32 }
 0x270   : > { %5858 = vmatmul.mubr.bf16.gmra.mrb[12].mxu1 %v5115_v35  ;;  %v3500_v35 = vrot.slane %v3498_v40, 5 }
 0x271   : > { %5866 = vmatpush3.bf16.msra.mxu1 %v6305_v32  ;;  %5877 = vmatprep.mubr.bf16.mxu1 %v6306_v57  ;;  %v3509_v32 = vshrl.u32 %v3444_v19, 16  ;;  %v3528_v57 = vrot.slane %v3526_v26, 5 }
 0x272   : > { %5867 = vmatprep.subr.bf16.mxu1 %v6307_v49  ;;  %v3501_v2 = vor.u32 %v3500_v35, %v3497_v63 }
 0x273   : > { %v3511_v41 = vrot.slane %v3509_v32, 4  ;;  %v3560_v32 = vshll.u32 %v7233_v17, 16 }
 0x275   : > { %5868 = vmatpush3.bf16.msra.mxu1 %v6307_v49  ;;  %v3525_v49 = vrot.slane %v3523_v21, 4 }
 0x276   : > { %5869 = vmatprep.subr.bf16.mxu1 %v6308_v36 }
 0x277   : > { %v3529_v47 = vor.u32 %v3528_v57, %v3525_v49  ;;  %v6324_v49 = vld [vmem:[%s7439_s4 + $0x148] sm:$0xff]  }
 0x279   : > { %5870 = vmatpush3.bf16.msra.mxu1 %v6308_v36  ;;  %v3450_v36 = vld [vmem:[#allocation2 + $0x40] sm:$0xf]  ;;  %v3530_v56 = vrot.slane %v3529_v47, 4 }
 0x27a   : > { %5871 = vmatprep.subr.bf16.mxu1 %v6309_v59  ;;  %v3551_v7 = vshrl.u32 %v3450_v36, 16  ;;  %v3554_v44 = vshll.u32 %v3450_v36, 16  ;;  %v3546_v36 = vshll.u32 %v7239_v30, 16 }
 0x27c   : > { %v3553_v29 = vrot.slane %v3551_v7, 4  ;;  %v3556_v9 = vrot.slane %v3554_v44, 5  ;;  %v3744_v44 = vrot.slane %v7189_v53, 5  ;;  %v3548_v47 = vrot.slane %v3546_v36, 5  ;;  %v6326_v53 = vld [vmem:[%s7439_s4 + $0x158] sm:$0xff]  }
 0x27d   : > { %5872 = vmatpush3.bf16.msra.mxu1 %v6309_v59  ;;  %v6321_v59 = vld [vmem:[%s7439_s4 + $0x130] sm:$0xff]  }
 0x27e   : > { %5873 = vmatprep.subr.bf16.mxu1 %v6310_v23  ;;  %v3557_v19 = vor.u32 %v3556_v9, %v3553_v29  ;;  %v3723_v29 = vld [vmem:[#allocation2 + $0x30] sm:$0xe]  ;;  %v6330_v9 = vld [vmem:[%s7439_s4 + $0x178] sm:$0xff]  }
 0x281   : > { %5874 = vmatpush3.bf16.msra.mxu1 %v6310_v23  ;;  %v3486_v23 = vrot.slane %v3484_v25, 5 }
 0x282   : > { %5875 = vmatprep.subr.bf16.mxu1 %v6311_v55 }
 0x283   : > { %v3487_v48 = vor.u32 %v3486_v23, %v3483_v38  ;;  %v3718_v38 = vld [vmem:[#allocation2 + $0x8] sm:$0xe]  ;;  %v5181_v23 = vrot.slane %v3719_v34, 9  ;;  %v3772_v34 = vrot.slane %v7233_v17, 5  ;;  %v6335_v17 = vld [vmem:[%s7439_s4 + $0x198] sm:$0xff]  }
 0x284   : > { %v5180_v7 = vrot.slane %v3718_v38, 9  ;;  %v6334_v38 = vld [vmem:[#allocation2 + $0x10] ss:$8 sps:$4 sm:$0xff]  }
 0x285   : > { %5876 = vmatpush3.bf16.msra.mxu1 %v6311_v55  ;;  %v3448_v55 = vld [vmem:[#allocation2 + $0x38] sm:$0xf] }
 0x286   : > { %5885 = vmatprep.subr.bf16.mxu1 %v6313_v45  ;;  %v3540_v24 = vshll.u32 %v3448_v55, 16 }
 0x288   : > { %5878 = vmatmul.mubr.bf16.vlgmr.msra.gmra.mrb[8].mxu1 %v6312_v58  ;;  %v7222_v58 = vld [vmem:[#allocation2 + $0x2c] sm:$0x1] }
 0x289   : > { %5881 = vmatprep.mubr.bf16.mxu1 %v6314_v10  ;;  %5886 = vmatpush3.bf16.msra.mxu1 %v6313_v45  ;;  %v7219_v45 = vld [vmem:[#allocation2 + $0x1c] sm:$0x1]  ;;  %v3515_v10 = vor.u32 %v3514_v54, %v3511_v41  ;;  %v3518_v43 = vshll.u32 %v7222_v58, 16  ;;  %v3748_v41 = vrot.slane %v7187_v61, 5 }
 0x28a   : > { %5887 = vmatprep.subr.bf16.mxu1 %v6315_v62  ;;  %v3490_v1 = vshll.u32 %v7219_v45, 16 }
 0x28b   : > { %v3516_v16 = vrot.slane %v3515_v10, 4  ;;  %v3520_v21 = vrot.slane %v3518_v43, 5  ;;  %v3749_v52 = vsel %vm6935_vm11, %v5181_v23, %v3748_v41  ;;  %v6327_v10 = vld [vmem:[%s7439_s4 + $0x160] sm:$0xff]   ;;  %v3720_v43 = vld [vmem:[#allocation2 + $0x18] sm:$0xe]  ;;  %v6337_v23 = vld [vmem:[%s7439_s4 + $0x1a8] sm:$0xff]  }
 0x28c   : > { %v3492_v18 = vrot.slane %v3490_v1, 5  ;;  %v6329_v1 = vld [vmem:[%s7439_s4 + $0x170] sm:$0xff]  }
 0x28d   : > { %5888 = vmatpush3.bf16.msra.mxu1 %v6315_v62  ;;  %v3537_v62 = vshrl.u32 %v3448_v55, 16  ;;  %v3521_v35 = vsel %vm6506_vm2, %v3516_v16, %v3520_v21  ;;  %v3562_v55 = vrot.slane %v3560_v32, 5  ;;  %v3752_v16 = vrot.slane %v7219_v45, 5  ;;  %v3725_v21 = vld [vmem:[#allocation2 + $0x40] sm:$0xe]  ;;  %v6338_v41 = vld [vmem:[%s7439_s4 + $0x1b0] sm:$0xff]  }
 0x28e   : > { %5889 = vmatprep.subr.bf16.mxu1 %v6317_v3  ;;  %v5187_v32 = vrot.slane %v3725_v21, 9  ;;  %v4110_v21 = vld [vmem:[#allocation2 + $0x3c] sm:$0x1] }
 0x290   : > { %5882 = vmatmul.mubr.bf16.gmra.mrb[12].mxu1 %v6316_v11  ;;  %v3488_v11 = vrot.slane %v3487_v48, 4 }
 0x291   : > { %5890 = vmatpush3.bf16.msra.mxu1 %v6317_v3  ;;  %5901 = vmatprep.mubr.bf16.mxu1 %v5168_v33  ;;  %v3502_v3 = vrot.slane %v3501_v2, 4  ;;  %v3542_v33 = vrot.slane %v3540_v24, 5  ;;  %v6325_v2 = vld [vmem:[%s7439_s4 + $0x150] sm:$0xff]   ;;  %v3745_v24 = vsel %vm6935_vm11, %v5180_v7, %v3744_v44  ;;  %v6343_v7 = vld [vmem:[%s7439_s4 + $0x1c8] sm:$0xff]  }
 0x292   : > { %5891 = vmatprep.subr.bf16.mxu1 %v6318_v22  ;;  %v3493_v25 = vsel %vm6506_vm2, %v3488_v11, %v3492_v18  ;;  %v3756_v11 = vrot.slane %v7215_v28, 5  ;;  %v6342_v44 = vld [vmem:[#allocation2 + $0x30] ss:$8 sps:$4 sm:$0xff]  }
 0x293   : > { %v3507_v40 = vsel %vm6506_vm2, %v3502_v3, %v3506_v14  ;;  %v3721_v3 = vld [vmem:[#allocation2 + $0x20] sm:$0xe]  ;;  %v3722_v14 = vld [vmem:[#allocation2 + $0x28] sm:$0xe] }
 0x294   : > { %v5169_v63 = vcombine.low %v3493_v25, %v3507_v40  ;;  %v5184_v18 = vrot.slane %v3722_v14, 9  ;;  %v3760_v40 = vrot.slane %v7222_v58, 5  ;;  %v6332_v58 = vld [vmem:[%s7439_s4 + $0x188] sm:$0xff]   ;;  %v3724_v25 = vld [vmem:[#allocation2 + $0x38] sm:$0xe]  ;;  %v6349_v14 = vld [vmem:[%s7439_s4 + $0x1f0] sm:$0xff]  }
 0x295   : > { %5892 = vmatpush3.bf16.msra.mxu1 %v6318_v22  ;;  %v3539_v22 = vrot.slane %v3537_v62, 4 }
 0x296   : > { %5893 = vmatprep.subr.bf16.mxu1 %v6319_v20 }
 0x299   : > { %5894 = vmatpush3.bf16.msra.mxu1 %v6319_v20  ;;  %v3534_v20 = vrot.slane %v3532_v0, 5  ;;  %v6328_v0 = vld [vmem:[%s7439_s4 + $0x168] sm:$0xff]  }
 0x29a   : > { %5895 = vmatprep.subr.bf16.mxu1 %v6320_v31 }
 0x29b   : > { %v3535_v26 = vsel %vm6506_vm2, %v3530_v56, %v3534_v20  ;;  %v5183_v56 = vrot.slane %v3721_v3, 9  ;;  %v6331_v20 = vld [vmem:[%s7439_s4 + $0x180] sm:$0xff]   ;;  %v4113_v3 = vld [vmem:[#allocation2 + $0x48] sm:$0xf] }
 0x29c   : > { %v5170_v57 = vcombine.low %v3521_v35, %v3535_v26  ;;  %v3761_v26 = vsel %vm6935_vm11, %v5184_v18, %v3760_v40  ;;  %v3768_v35 = vrot.slane %v7239_v30, 5  ;;  %v6336_v30 = vld [vmem:[%s7439_s4 + $0x1a0] sm:$0xff]  }
 0x29d   : > { %5896 = vmatpush3.bf16.msra.mxu1 %v6320_v31  ;;  %v3543_v31 = vor.u32 %v3542_v33, %v3539_v22  ;;  %v5185_v22 = vrot.slane %v3723_v29, 9  ;;  %v3764_v33 = vrot.slane %v7217_v42, 5 }
 0x29e   : > { %5897 = vmatprep.subr.bf16.mxu1 %v6321_v59 }
 0x29f   : > { %v3544_v54 = vrot.slane %v3543_v31, 4  ;;  %v3765_v28 = vsel %vm6935_vm11, %v5185_v22, %v3764_v33 }
 0x2a0   : > { %v5206_v31 = vcombine.low %v3761_v26, %v3765_v28 }
 0x2a1   : > { %5898 = vmatpush3.bf16.msra.mxu1 %v6321_v59  ;;  %v3558_v59 = vrot.slane %v3557_v19, 4  ;;  %v3549_v61 = vsel %vm6506_vm2, %v3544_v54, %v3548_v47  ;;  %v3757_v19 = vsel %vm6935_vm11, %v5183_v56, %v3756_v11  ;;  %v6339_v54 = vld [vmem:[%s7439_s4 + $0x1b8] sm:$0xff]   ;;  %v6345_v47 = vld [vmem:[%s7439_s4 + $0x1d0] sm:$0xff]  }
 0x2a2   : > { %5899 = vmatprep.subr.bf16.mxu1 %v6322_v15 }
 0x2a3   : > { %v3563_v48 = vsel %vm6506_vm2, %v3558_v59, %v3562_v55  ;;  %v6341_v55 = vld [vmem:[%s7439_s4 + $0x1c0] sm:$0xff]  }
 0x2a4   : > { %v5171_v62 = vcombine.low %v3549_v61, %v3563_v48  ;;  %v6344_v48 = vld [vmem:[#allocation2 + $0x40] ss:$8 sps:$4 sm:$0xff]   ;;  %v4107_v61 = vld [vmem:[#allocation2 + $0x30] sm:$0xf] }
 0x2a5   : > { %5900 = vmatpush3.bf16.msra.mxu1 %v6322_v15  ;;  %v5204_v15 = vcombine.low %v3745_v24, %v3749_v52  ;;  %v6346_v52 = vld [vmem:[%s7439_s4 + $0x1d8] sm:$0xff]  }
 0x2a6   : > { %5909 = vmatprep.subr.bf16.mxu1 %v6323_v39  ;;  %v4109_v24 = vld [vmem:[#allocation2 + $0x38] sm:$0xf] }
 0x2a8   : > { %5902 = vmatmul.mubr.bf16.vlgmr.msra.gmra.mrb[8].mxu1 %v5169_v63  ;;  %v5186_v63 = vrot.slane %v3724_v25, 9 }
 0x2a9   : > { %5905 = vmatprep.mubr.bf16.mxu1 %v5170_v57  ;;  %5910 = vmatpush3.bf16.msra.mxu1 %v6323_v39  ;;  %v5182_v39 = vrot.slane %v3720_v43, 9  ;;  %v3773_v57 = vsel %vm6935_vm11, %v5187_v32, %v3772_v34  ;;  %v4111_v43 = vld [vmem:[#allocation2 + $0x40] sm:$0xf] }
 0x2aa   : > { %5911 = vmatprep.subr.bf16.mxu1 %v6324_v49  ;;  %v3769_v36 = vsel %vm6935_vm11, %v5186_v63, %v3768_v35  ;;  %v4200_v18 = vshrl.u32 %v4111_v43, 16  ;;  %v4203_v40 = vshll.u32 %v4111_v43, 16  ;;  %v4195_v63 = vshll.u32 %v4110_v21, 16 }
 0x2ab   : > { %v3753_v42 = vsel %vm6935_vm11, %v5182_v39, %v3752_v16  ;;  %v5207_v59 = vcombine.low %v3769_v36, %v3773_v57  ;;  %v4214_v39 = vshrl.u32 %v4113_v3, 16  ;;  %v4112_v57 = vld [vmem:[#allocation2 + $0x44] sm:$0x1]  ;;  %v4114_v36 = vld [vmem:[#allocation2 + $0x4c] sm:$0x1] }
 0x2ac   : > { %v5205_v45 = vcombine.low %v3753_v42, %v3757_v19  ;;  %v4217_v19 = vshll.u32 %v4113_v3, 16  ;;  %v6350_v42 = vld [vmem:[%s7439_s4 + $0x1f8] sm:$0xff]   ;;  %v4205_v25 = vrot.slane %v4203_v40, 5  ;;  %v4435_v40 = vrot.slane %v4114_v36, 5 }
 0x2ad   : > { %5912 = vmatpush3.bf16.msra.mxu1 %v6324_v49  ;;  %v6333_v49 = vld [vmem:[%s7439_s4 + $0x190] sm:$0xff]  }
 0x2ae   : > { %5913 = vmatprep.subr.bf16.mxu1 %v6325_v2  ;;  %v4219_v32 = vrot.slane %v4217_v19, 5 }
 0x2b0   : > { %5906 = vmatmul.mubr.bf16.gmra.mrb[12].mxu1 %v5171_v62  ;;  %v6347_v62 = vld [vmem:[%s7439_s4 + $0x1e0] sm:$0xff]  }
 0x2b1   : > { %5914 = vmatpush3.bf16.msra.mxu1 %v6325_v2  ;;  %5925 = vmatprep.mubr.bf16.mxu1 %v5204_v15  ;;  %v6340_v2 = vld [vmem:[#allocation2 + $0x20] ss:$8 sps:$4 sm:$0xff]   ;;  %v4175_v15 = vshll.u32 %v4107_v61, 16 }
 0x2b2   : > { %5915 = vmatprep.subr.bf16.mxu1 %v6326_v53 }
 0x2b5   : > { %5916 = vmatpush3.bf16.msra.mxu1 %v6326_v53  ;;  %v4172_v53 = vshrl.u32 %v4107_v61, 16 }
 0x2b6   : > { %5917 = vmatprep.subr.bf16.mxu1 %v6327_v10 }
 0x2b9   : > { %5918 = vmatpush3.bf16.msra.mxu1 %v6327_v10  ;;  %v6348_v10 = vld [vmem:[%s7439_s4 + $0x1e8] sm:$0xff]  }
 0x2ba   : > { %5919 = vmatprep.subr.bf16.mxu1 %v6328_v0 }
 0x2bd   : > { %5920 = vmatpush3.bf16.msra.mxu1 %v6328_v0  ;;  %v4186_v0 = vshrl.u32 %v4109_v24, 16 }
 0x2be   : > { %5921 = vmatprep.subr.bf16.mxu1 %v6329_v1 }
 0x2bf   : > { %v4188_v22 = vrot.slane %v4186_v0, 4 }
 0x2c1   : > { %5922 = vmatpush3.bf16.msra.mxu1 %v6329_v1  ;;  %v4189_v1 = vshll.u32 %v4109_v24, 16 }
 0x2c2   : > { %5923 = vmatprep.subr.bf16.mxu1 %v6330_v9 }
 0x2c3   : > { %v4191_v33 = vrot.slane %v4189_v1, 5 }
 0x2c5   : > { %5924 = vmatpush3.bf16.msra.mxu1 %v6330_v9  ;;  %v4177_v9 = vrot.slane %v4175_v15, 5  ;;  %v4192_v26 = vor.u32 %v4191_v33, %v4188_v22  ;;  %v6356_v22 = vld [vmem:[%s7439_s4 + $0x228] sm:$0xff]   ;;  %v4387_v33 = vld [vmem:[#allocation2 + $0x40] sm:$0xe] }
 0x2c6   : > { %5933 = vmatprep.subr.bf16.mxu1 %v6331_v20  ;;  %v5278_v19 = vrot.slane %v4387_v33, 9 }
 0x2c8   : > { %5926 = vmatmul.mubr.bf16.vlgmr.msra.gmra.mrb[8].mxu1 %v5205_v45 }
 0x2c9   : > { %5929 = vmatprep.mubr.bf16.mxu1 %v5206_v31  ;;  %5934 = vmatpush3.bf16.msra.mxu1 %v6331_v20  ;;  %v4108_v20 = vld [vmem:[#allocation2 + $0x34] sm:$0x1]  ;;  %v4216_v31 = vrot.slane %v4214_v39, 4  ;;  %v4388_v39 = vld [vmem:[#allocation2 + $0x48] sm:$0xe] }
 0x2ca   : > { %5935 = vmatprep.subr.bf16.mxu1 %v6332_v58  ;;  %v4181_v45 = vshll.u32 %v4108_v20, 16 }
 0x2cc   : > { %v4183_v35 = vrot.slane %v4181_v45, 5 }
 0x2cd   : > { %5936 = vmatpush3.bf16.msra.mxu1 %v6332_v58  ;;  %v4202_v58 = vrot.slane %v4200_v18, 4  ;;  %v4431_v18 = vrot.slane %v4112_v57, 5 }
 0x2ce   : > { %5937 = vmatprep.subr.bf16.mxu1 %v6333_v49 }
 0x2d0   : > { %5930 = vmatmul.mubr.bf16.gmra.mrb[12].mxu1 %v5207_v59  ;;  %v4206_v59 = vor.u32 %v4205_v25, %v4202_v58  ;;  %v5046_v58 = vld [vmem:[%s7443_s8] ss:$0 sm:$0xff] }
 0x2d1   : > { %5938 = vmatpush3.bf16.msra.mxu1 %v6333_v49  ;;  %5949 = vmatprep.mubr.bf16.mxu1 %v6334_v38  ;;  %v4193_v49 = vrot.slane %v4192_v26, 4  ;;  %v4223_v38 = vshll.u32 %v4114_v36, 16 }
 0x2d2   : > { %5939 = vmatprep.subr.bf16.mxu1 %v6335_v17 }
 0x2d5   : > { %5940 = vmatpush3.bf16.msra.mxu1 %v6335_v17  ;;  %v4220_v17 = vor.u32 %v4219_v32, %v4216_v31  ;;  %v5308_v31 = vld [vmem:[%s7440_s5] ss:$0 sm:$0xff]  ;;  %v2605_v32 = vmul.f32 %v7113_v60, %v5046_v58 }
 0x2d6   : > { %5941 = vmatprep.subr.bf16.mxu1 %v6336_v30 }
 0x2d9   : > { %5942 = vmatpush3.bf16.msra.mxu1 %v6336_v30 }
 0x2da   : > { %5943 = vmatprep.subr.bf16.mxu1 %v6337_v23 }
 0x2dd   : > { %5944 = vmatpush3.bf16.msra.mxu1 %v6337_v23  ;;  %v4197_v23 = vrot.slane %v4195_v63, 5 }
 0x2de   : > { %5945 = vmatprep.subr.bf16.mxu1 %v6338_v41 }
 0x2e1   : > { %5946 = vmatpush3.bf16.msra.mxu1 %v6338_v41  ;;  %v4209_v41 = vshll.u32 %v4112_v57, 16 }
 0x2e2   : > { %5947 = vmatprep.subr.bf16.mxu1 %v6339_v54 }
 0x2e3   : > { %v4211_v24 = vrot.slane %v4209_v41, 5  ;;  %v2620_v41 = vadd.f32 %v5047_v12, %v2605_v32 }
 0x2e5   : > { %5948 = vmatpush3.bf16.msra.mxu1 %v6339_v54  ;;  %v4385_v54 = vld [vmem:[#allocation2 + $0x30] sm:$0xe] }
 0x2e6   : > { %5957 = vmatprep.subr.bf16.mxu1 %v6341_v55  ;;  %v5276_v61 = vrot.slane %v4385_v54, 9 }
 0x2e8   : > { %5950 = vmatmul.mubr.bf16.vlgmr.msra.gmra.mrb[8].mxu1 %v6340_v2  ;;  %v4198_v2 = vsel %vm6506_vm2, %v4193_v49, %v4197_v23  ;;  %v5309_v49 = vld [vmem:[%s7441_s6] ss:$0 sm:$0xff] }
 0x2e9   : > { %5953 = vmatprep.mubr.bf16.mxu1 %v6342_v44  ;;  %5958 = vmatpush3.bf16.msra.mxu1 %v6341_v55  ;;  %v6351_v55 = vld [vmem:[%s7439_s4 + $0x200] sm:$0xff]   ;;  %v4207_v44 = vrot.slane %v4206_v59, 4  ;;  %v2606_v59 = vmul.f32 %v7124_v6, %v5046_v58 }
 0x2ea   : > { %5959 = vmatprep.subr.bf16.mxu1 %v6343_v7 }
 0x2eb   : > { %v4212_v0 = vsel %vm6506_vm2, %v4207_v44, %v4211_v24 }
 0x2ed   : > { %5960 = vmatpush3.bf16.msra.mxu1 %v6343_v7 }
 0x2ee   : > { %5961 = vmatprep.subr.bf16.mxu1 %v6345_v47 }
 0x2f0   : > { %5954 = vmatmul.mubr.bf16.gmra.mrb[12].mxu1 %v6344_v48  ;;  %v4225_v48 = vrot.slane %v4223_v38, 5  ;;  %v2604_v38 = vmul.f32 %v5046_v58, %v7130_v13 }
 0x2f1   : > { %5962 = vmatpush3.bf16.msra.mxu1 %v6345_v47  ;;  %5973 = vmatprep.mubr.bf16.mxu1 %v7117_v4  ;;  %v4174_v4 = vrot.slane %v4172_v53, 4  ;;  %v4221_v47 = vrot.slane %v4220_v17, 4  ;;  %v6352_v53 = vld [vmem:[%s7439_s4 + $0x208] sm:$0xff]  }
 0x2f2   : > { %5963 = vmatprep.subr.bf16.mxu1 %v6346_v52  ;;  %v2619_v6 = vadd.f32 %v5047_v12, %v2604_v38 }
 0x2f3   : > { %v4178_v28 = vor.u32 %v4177_v9, %v4174_v4  ;;  %v4226_v1 = vsel %vm6506_vm2, %v4221_v47, %v4225_v48  ;;  %v6353_v4 = vld [vmem:[%s7439_s4 + $0x210] sm:$0xff]  }
 0x2f4   : > { %v5263_v3 = vcombine.low %v4212_v0, %v4226_v1  ;;  %v2610_v0 = vmul.f32 %v7171_v37, %v5046_v58 }
 0x2f5   : > { %5964 = vmatpush3.bf16.msra.mxu1 %v6346_v52  ;;  %v4179_v34 = vrot.slane %v4178_v28, 4  ;;  %v4386_v52 = vld [vmem:[#allocation2 + $0x38] sm:$0xe]  ;;  %v5279_v28 = vrot.slane %v4388_v39, 9 }
 0x2f6   : > { %5965 = vmatprep.subr.bf16.mxu1 %v6347_v62  ;;  %v5277_v15 = vrot.slane %v4386_v52, 9 }
 0x2f7   : > { %v4184_v30 = vsel %vm6506_vm2, %v4179_v34, %v4183_v35  ;;  %v4436_v45 = vsel %vm6935_vm11, %v5279_v28, %v4435_v40  ;;  %v2603_v35 = vmul.f32 %v5046_v58, %v7119_v27 }
 0x2f8   : > { %v7339_v29 = vpop.f32.mrb[8].mxu0  ;;  %v5262_v7 = vcombine.low %v4184_v30, %v4198_v2 }
 0x2f9   : > { %5966 = vmatpush3.bf16.msra.mxu1 %v6347_v62  ;;  %v7341_v56 = vpop.f32.mrb[9].mxu0  ;;  %v4423_v62 = vrot.slane %v4108_v20, 5  ;;  %v6357_v20 = vld [vmem:[%s7439_s4 + $0x230] sm:$0xff]  }
 0x2fa   : > { %5967 = vmatprep.subr.bf16.mxu1 %v6348_v10  ;;  %v7343_v11 = vpop.f32.mrb[10].mxu0 }
 0x2fb   : > { %v7348_v16 = vpop.f32.mrb[11].mxu0 }
 0x2fd   : > { %5968 = vmatpush3.bf16.msra.mxu1 %v6348_v10  ;;  %v4427_v10 = vrot.slane %v4110_v21, 5  ;;  %v6358_v21 = vld [vmem:[%s7439_s4 + $0x238] sm:$0xff]  }
 0x2fe   : > { %5969 = vmatprep.subr.bf16.mxu1 %v6349_v14 }
 0x2ff   : > { %v4428_v9 = vsel %vm6935_vm11, %v5277_v15, %v4427_v10  ;;  %v2607_v15 = vmul.f32 %v5046_v58, %v7166_v50  ;;  %v2625_v50 = vadd.f32 %v5047_v12, %v2610_v0 }
 0x301   : > { %5970 = vmatpush3.bf16.msra.mxu1 %v6349_v14  ;;  %v6355_v14 = vld [vmem:[%s7439_s4 + $0x220] sm:$0xff]   ;;  %v2622_v33 = vadd.f32 %v5047_v12, %v2607_v15 }
 0x302   : > { %5971 = vmatprep.subr.bf16.mxu1 %v6350_v42 }
 0x305   : > { %5972 = vmatpush3.bf16.msra.mxu1 %v6350_v42  ;;  %v4432_v42 = vsel %vm6935_vm11, %v5278_v19, %v4431_v18 }
 0x306   : > { %6005 = vmatprep.subr.bf16.mxu1 %v6351_v55  ;;  %v5299_v26 = vcombine.low %v4432_v42, %v4436_v45 }
 0x308   : > { %5974 = vmatmul.mubr.bf16.vlgmr.msra.gmra.mrb[8].mxu1 %v7132_v5  ;;  %v4424_v5 = vsel %vm6935_vm11, %v5276_v61, %v4423_v62 }
 0x309   : > { %5977 = vmatprep.mubr.bf16.mxu1 %v5262_v7  ;;  %6013 = vmatpush3.bf16.msra.mxu1 %v6351_v55  ;;  %v5298_v43 = vcombine.low %v4424_v5, %v4428_v9  ;;  %v2618_v55 = vadd.f32 %v5047_v12, %v2603_v35 }
 0x30a   : > { %6006 = vmatprep.subr.bf16.mxu1 %v6352_v53 }
 0x30d   : > { %6014 = vmatpush3.bf16.msra.mxu1 %v6352_v53  ;;  %v2609_v53 = vmul.f32 %v7164_v8, %v5046_v58 }
 0x30e   : > { %6007 = vmatprep.subr.bf16.mxu1 %v6353_v4 }
 0x310   : > { %5978 = vmatmul.mubr.bf16.gmra.mrb[12].mxu1 %v5263_v3  ;;  %v2608_v3 = vmul.f32 %v5046_v58, %v7173_v51 }
 0x311   : > { %6015 = vmatpush3.bf16.msra.mxu1 %v6353_v4  ;;  %6001 = vmatprep.mubr.bf16.mxu1 %v5298_v43  ;;  %v2624_v43 = vadd.f32 %v5047_v12, %v2609_v53 }
 0x312   : > { %6008 = vmatprep.subr.bf16.mxu1 %v6354_v46  ;;  %v2623_v18 = vadd.f32 %v5047_v12, %v2608_v3 }
 0x315   : > { %6016 = vmatpush3.bf16.msra.mxu1 %v6354_v46 }
 0x316   : > { %6009 = vmatprep.subr.bf16.mxu1 %v6355_v14 }
 0x319   : > { %6017 = vmatpush3.bf16.msra.mxu1 %v6355_v14 }
 0x31a   : > { %6010 = vmatprep.subr.bf16.mxu1 %v6356_v22 }
 0x31d   : > { %6018 = vmatpush3.bf16.msra.mxu1 %v6356_v22 }
 0x31e   : > { %6011 = vmatprep.subr.bf16.mxu1 %v6357_v20 }
 0x321   : > { %6019 = vmatpush3.bf16.msra.mxu1 %v6357_v20 }
 0x322   : > { %6012 = vmatprep.subr.bf16.mxu1 %v6358_v21 }
 0x325   : > { %6020 = vmatpush3.bf16.msra.mxu1 %v6358_v21 }
 0x328   : > { %6002 = vmatmul.mubr.bf16.vlgmr.msra.gmra.mrb[12].mxu1 %v5299_v26 }
 0x3db   : > { %v5975_v25 = vpop.f32.mrb[8].mxu1 }
 0x3dc   : > { %v6021_v34 = vadd.f32 %v7339_v29, %v5975_v25  ;;  %v4342_v63 = vpop.f32.mrb[9].mxu1 }
 0x3dd   : > { %v6022_v57 = vadd.f32 %v7341_v56, %v4342_v63  ;;  %v5976_v36 = vpop.f32.mrb[10].mxu1  ;;  %v2621_v56 = vadd.f32 %v5047_v12, %v2606_v59 }
 0x3de   : > { %v4600_v60 = vmul.f32 %v6021_v34, %v5308_v31  ;;  %v6023_v17 = vadd.f32 %v7343_v11, %v5976_v36  ;;  %v4345_v29 = vpop.f32.mrb[11].mxu1 }
 0x3df   : > { %v4598_v30 = vmul.f32 %v6022_v57, %v5308_v31  ;;  %v6024_v23 = vadd.f32 %v7348_v16, %v4345_v29 }
 0x3e0   : > { %v4615_v27 = vadd.f32 %v5309_v49, %v4600_v60  ;;  %v4601_v54 = vmul.f32 %v6023_v17, %v5308_v31 }
 0x3e1   : > { %v4613_v2 = vadd.f32 %v5309_v49, %v4598_v30  ;;  %v4599_v7 = vmul.f32 %v6024_v23, %v5308_v31 }
 0x3e2   : > { %v4623_v44 = vadd.f32 %v4615_v27, %v2620_v41  ;;  %v4616_v47 = vadd.f32 %v5309_v49, %v4601_v54 }
 0x3e3   : > { %v4621_v13 = vadd.f32 %v4613_v2, %v2618_v55  ;;  %v4614_v11 = vadd.f32 %v5309_v49, %v4599_v7 }
 0x3e4   : > { %v4631_v16 = vmax.f32 %v4623_v44, 0.0  ;;  %v4624_v48 = vadd.f32 %v4616_v47, %v2621_v56 }
 0x3e5   : > { %v4629_v52 = vmax.f32 %v4621_v13, 0.0  ;;  %v4622_v61 = vadd.f32 %v4614_v11, %v2619_v6 }
 0x3e6   : > { %4639 = vst [vmem:[%s7418_s21 + $0x10] sm:$0xff] %v4631_v16  ;;  %v4632_v62 = vmax.f32 %v4624_v48, 0.0 }
 0x3e7   : > { %4637 = vst [vmem:[%s7418_s21] sm:$0xff] %v4629_v52  ;;  %v4630_v24 = vmax.f32 %v4622_v61, 0.0 }
 0x3e8   : > { %4640 = vst [vmem:[%s7418_s21 + $0x18] sm:$0xff] %v4632_v62 }
 0x3e9   : > { %4638 = vst [vmem:[%s7418_s21 + $0x8] sm:$0xff] %v4630_v24 }
 0x3fb   : > { %v6003_v10 = vpop.f32.mrb[12].mxu1 }
 0x3fc   : > { %v4604_v1 = vmul.f32 %v6003_v10, %v5308_v31  ;;  %v4568_v5 = vpop.f32.mrb[13].mxu1 }
 0x3fd   : > { %v4602_v4 = vmul.f32 %v5308_v31, %v4568_v5  ;;  %v6004_v9 = vpop.f32.mrb[14].mxu1 }
 0x3fe   : > { %v4619_v46 = vadd.f32 %v5309_v49, %v4604_v1  ;;  %v4605_v14 = vmul.f32 %v6004_v9, %v5308_v31  ;;  %v4571_v22 = vpop.f32.mrb[15].mxu1 }
 0x3ff   : > { %v4617_v39 = vadd.f32 %v5309_v49, %v4602_v4  ;;  %v4603_v8 = vmul.f32 %v5308_v31, %v4571_v22 }
 0x400   : > { %v4627_v20 = vadd.f32 %v4619_v46, %v2624_v43  ;;  %v4620_v37 = vadd.f32 %v5309_v49, %v4605_v14 }
 0x401   : > { %v4625_v40 = vadd.f32 %v4617_v39, %v2622_v33  ;;  %v4618_v19 = vadd.f32 %v5309_v49, %v4603_v8 }
 0x402   : > { %v4635_v51 = vmax.f32 %v4627_v20, 0.0  ;;  %v4628_v28 = vadd.f32 %v4620_v37, %v2625_v50 }
 0x403   : > { %v4633_v21 = vmax.f32 %v4625_v40, 0.0  ;;  %v4626_v42 = vadd.f32 %v4618_v19, %v2623_v18 }
 0x404   : > { %4643 = vst [vmem:[%s7418_s21 + $0x30] sm:$0xff] %v4635_v51  ;;  %v4636_v45 = vmax.f32 %v4628_v28, 0.0 }
 0x405   : > { %4641 = vst [vmem:[%s7418_s21 + $0x20] sm:$0xff] %v4633_v21  ;;  %v4634_v26 = vmax.f32 %v4626_v42, 0.0 }
 0x406   : > { %4644 = vst [vmem:[%s7418_s21 + $0x38] sm:$0xff] %v4636_v45 }
 0x407   : > { %4642 = vst [vmem:[%s7418_s21 + $0x28] sm:$0xff] %v4634_v26 }
 0x408 PF: > { %s20_s13 = sadd.s32 1, %s6365_s13  }
 0x409   : > { %p17_p4 = scmp.ge.s32.totalorder %s20_s13, 4  }
 0x40b   :  { %19 = sbr.rel (!%p17_p4) target bundleno = 1 (0x1), region = 113 }

</bundles_post_ra>
